<compile_context>
chip_gen: v7x
topology: tpu7x:2x2x1
jax: 0.10.0
libtpu: 0.0.40
codegen_flags: <defaults>
</compile_context>

<pallas_src>
import math

import jax
import jax.numpy as jnp
from jax.experimental import pallas as pl
from jax.experimental.pallas import tpu as pltpu

# ----- hyperparameters (mirrors DSANet hparams, small demo sizes) -----
WINDOW = 16       # window
N_MULTIV = 8      # n_multiv  (self-attention sequence length)
N_KERNELS = 8     # n_kernels (conv output channels)
W_KERNEL = 1      # w_kernel
LOCAL = 3         # local (conv kernel height)
D_MODEL = 32
D_INNER = 64
N_LAYERS = 2
N_HEAD = 4
D_K = 8
D_V = 8
DROP_PROB = 0.0   # dropout == identity
BATCH = 2
EPS = 1e-5        # torch.nn.LayerNorm default


# ---------------- fused Pallas kernel ----------------

def _layernorm(x, g, b):
    """LayerNorm over last dim (biased variance, like torch)."""
    mean = jnp.mean(x, axis=-1, keepdims=True)
    var = jnp.mean(jnp.square(x - mean), axis=-1, keepdims=True)
    return (x - mean) * jax.lax.rsqrt(var + EPS) * g + b


def fused_forward_kernel(
    x_ref,                         # (1, WINDOW, M)       one batch element
    conv_w_ref, conv_b_ref,        # (LOCAL, C), (1, C)
    in_w_ref, in_b_ref,            # (C, D), (1, D)
    wqkv_ref, bqkv_ref,            # (L, D, 3*NH*DK), (L, 1, 3*NH*DK)
    fcw_ref, fcb_ref,              # (L, NH*DV, D), (L, 1, D)
    ln1g_ref, ln1b_ref,            # (L, 1, D) each
    w1_ref, b1_ref,                # (L, D, D_INNER), (L, 1, D_INNER)
    w2_ref, b2_ref,                # (L, D_INNER, D), (L, 1, D)
    ln2g_ref, ln2b_ref,            # (L, 1, D) each
    outw_ref, outb_ref,            # (D, C), (1, C)
    o_ref,                         # (1, M, C)
):
    x = x_ref[0]                   # (WINDOW, M)

    # ---- conv2d(1->C, kernel (LOCAL,1)) + ReLU + AdaptiveMaxPool2d((1, M)) ----
    # max over time commutes with the per-(m,c) bias-add + ReLU (both monotone,
    # independent of the reduction axis), so pool the raw conv response first
    # and only then apply bias + ReLU on the small (M, C) tile.
    w = conv_w_ref[...]            # (LOCAL, C)
    lout = WINDOW - LOCAL + 1
    acc = jnp.zeros((lout, N_MULTIV, N_KERNELS), jnp.float32)
    for j in range(LOCAL):         # static unroll, LOCAL is small
        acc = acc + x[j:j + lout, :, None] * w[j][None, None, :]
    pooled = jnp.max(acc, axis=0)                               # (M, C): max over time
    pooled = jnp.maximum(pooled + conv_b_ref[...], 0.0)         # bias + ReLU
    # dropout(p=0) == identity

    # ---- in_linear: (M, C) @ (C, D) ----
    enc = (jnp.dot(pooled, in_w_ref[...], preferred_element_type=jnp.float32)
           + in_b_ref[...])                                      # (M, D)

    inv_temp = 1.0 / math.sqrt(D_K)

    # ---- encoder layers ----
    for li in range(N_LAYERS):     # static unroll, N_LAYERS is small
        residual = enc
        # fused QKV projection: (M, D) @ (D, 3*NH*DK)
        qkv = (jnp.dot(enc, wqkv_ref[li], preferred_element_type=jnp.float32)
               + bqkv_ref[li])                                   # (M, 3*NH*DK)

        head_outs = []
        for h in range(N_HEAD):    # static per-head loop, all inside one call
            q = qkv[:, h * D_K:(h + 1) * D_K] * inv_temp                        # (M, DK)
            k = qkv[:, N_HEAD * D_K + h * D_K:N_HEAD * D_K + (h + 1) * D_K]     # (M, DK)
            v = qkv[:, 2 * N_HEAD * D_K + h * D_V:
                       2 * N_HEAD * D_K + (h + 1) * D_V]                        # (M, DV)
            # q @ k^T via dot_general contracting on d_k (no explicit transpose)
            s = jax.lax.dot_general(
                q, k, (((1,), (1,)), ((), ())),
                preferred_element_type=jnp.float32)                             # (M, M)
            s = s - jnp.max(s, axis=-1, keepdims=True)           # stable softmax
            e = jnp.exp(s)
            attn = e * pl.reciprocal(jnp.sum(e, axis=-1, keepdims=True),
                                     approx=True)
            head_outs.append(
                jnp.dot(attn, v, preferred_element_type=jnp.float32))           # (M, DV)

        attn_out = jnp.concatenate(head_outs, axis=1)            # (M, NH*DV), head-major
        out = (jnp.dot(attn_out, fcw_ref[li], preferred_element_type=jnp.float32)
               + fcb_ref[li])                                    # (M, D)
        out = _layernorm(out + residual, ln1g_ref[li], ln1b_ref[li])

        # position-wise FFN (1x1 conv pair == two linears) + residual + LayerNorm
        residual2 = out
        h1 = jnp.maximum(
            jnp.dot(out, w1_ref[li], preferred_element_type=jnp.float32)
            + b1_ref[li], 0.0)                                   # (M, D_INNER)
        h2 = (jnp.dot(h1, w2_ref[li], preferred_element_type=jnp.float32)
              + b2_ref[li])                                      # (M, D)
        enc = _layernorm(h2 + residual2, ln2g_ref[li], ln2b_ref[li])

    # ---- out_linear: (M, D) @ (D, C) ----
    o_ref[0] = (jnp.dot(enc, outw_ref[...], preferred_element_type=jnp.float32)
                + outb_ref[...])


# ---------------- wrapper ----------------

def forward(x, params):
    """x: (batch, window, n_multiv) -> (enc_output,), enc_output (batch, n_multiv, n_kernels)."""
    bsz = x.shape[0]

    weights = [
        params["conv_w"], params["conv_b"],
        params["in_w"], params["in_b"],
        params["w_qkv"], params["b_qkv"],
        params["fc_w"], params["fc_b"],
        params["ln1_g"], params["ln1_b"],
        params["w1"], params["b1"],
        params["w2"], params["b2"],
        params["ln2_g"], params["ln2_b"],
        params["out_w"], params["out_b"],
    ]

    def wspec(arr):
        nd = arr.ndim
        # Constant block index across the grid -> fetched to VMEM once, reused.
        return pl.BlockSpec(arr.shape, lambda b, _n=nd: (0,) * _n)

    in_specs = ([pl.BlockSpec((1, WINDOW, N_MULTIV), lambda b: (b, 0, 0))]
                + [wspec(w) for w in weights])

    out = pl.pallas_call(
        fused_forward_kernel,
        out_shape=jax.ShapeDtypeStruct((bsz, N_MULTIV, N_KERNELS), jnp.float32),
        grid=(bsz,),
        in_specs=in_specs,
        out_specs=pl.BlockSpec((1, N_MULTIV, N_KERNELS), lambda b: (b, 0, 0)),
        compiler_params=pltpu.CompilerParams(dimension_semantics=("parallel",)),
    )(x, *weights)
    return (out,)


# ---------------- parameter init ----------------

def init_params(key):
    keys = iter(jax.random.split(key, 64))

    def dense(shape, scale):
        return scale * jax.random.normal(next(keys), shape, jnp.float32)

    def stack(make):
        return jnp.stack([make() for _ in range(N_LAYERS)], axis=0)

    d_qkv = 3 * N_HEAD * D_K   # D_K == D_V

    params = {
        "conv_w": dense((LOCAL, N_KERNELS), 1.0 / math.sqrt(LOCAL * W_KERNEL)),
        "conv_b": dense((1, N_KERNELS), 0.05),
        "in_w": dense((N_KERNELS, D_MODEL), 1.0 / math.sqrt(N_KERNELS)),
        "in_b": dense((1, D_MODEL), 0.02),
        "out_w": dense((D_MODEL, N_KERNELS), 1.0 / math.sqrt(D_MODEL)),
        "out_b": dense((1, N_KERNELS), 0.02),
        # per-layer weights stacked along a leading layer axis
        "w_qkv": stack(lambda: dense((D_MODEL, d_qkv), 1.0 / math.sqrt(D_MODEL))),
        "b_qkv": stack(lambda: dense((1, d_qkv), 0.02)),
        "fc_w": stack(lambda: dense((N_HEAD * D_V, D_MODEL),
                                    1.0 / math.sqrt(N_HEAD * D_V))),
        "fc_b": stack(lambda: dense((1, D_MODEL), 0.02)),
        "ln1_g": jnp.ones((N_LAYERS, 1, D_MODEL), jnp.float32),
        "ln1_b": jnp.zeros((N_LAYERS, 1, D_MODEL), jnp.float32),
        "w1": stack(lambda: dense((D_MODEL, D_INNER), 1.0 / math.sqrt(D_MODEL))),
        "b1": stack(lambda: dense((1, D_INNER), 0.02)),
        "w2": stack(lambda: dense((D_INNER, D_MODEL), 1.0 / math.sqrt(D_INNER))),
        "b2": stack(lambda: dense((1, D_MODEL), 0.02)),
        "ln2_g": jnp.ones((N_LAYERS, 1, D_MODEL), jnp.float32),
        "ln2_b": jnp.zeros((N_LAYERS, 1, D_MODEL), jnp.float32),
    }
    return params


if __name__ == "__main__":
    key = jax.random.PRNGKey(0)
    pkey, xkey = jax.random.split(key)
    params = init_params(pkey)
    x = jax.random.normal(xkey, (BATCH, WINDOW, N_MULTIV), jnp.float32)

    fwd = jax.jit(forward)
    (out,) = fwd(x, params)
    out = jax.block_until_ready(out)
    assert out.shape == (BATCH, N_MULTIV, N_KERNELS), out.shape
    assert bool(jnp.all(jnp.isfinite(out)))
    print("KERNEL_OK")
</pallas_src>

<mosaic_0001>
module attributes {stable_mosaic.version = 11 : i64} {
  func.func @fused_forward_kernel(%arg0: i32, %arg1: memref<1x16x8xf32, #tpu.memory_space<vmem>>, %arg2: memref<3x8xf32, #tpu.memory_space<vmem>>, %arg3: memref<1x8xf32, #tpu.memory_space<vmem>>, %arg4: memref<8x32xf32, #tpu.memory_space<vmem>>, %arg5: memref<1x32xf32, #tpu.memory_space<vmem>>, %arg6: memref<2x32x96xf32, #tpu.memory_space<vmem>>, %arg7: memref<2x1x96xf32, #tpu.memory_space<vmem>>, %arg8: memref<2x32x32xf32, #tpu.memory_space<vmem>>, %arg9: memref<2x1x32xf32, #tpu.memory_space<vmem>>, %arg10: memref<2x1x32xf32, #tpu.memory_space<vmem>>, %arg11: memref<2x1x32xf32, #tpu.memory_space<vmem>>, %arg12: memref<2x32x64xf32, #tpu.memory_space<vmem>>, %arg13: memref<2x1x64xf32, #tpu.memory_space<vmem>>, %arg14: memref<2x64x32xf32, #tpu.memory_space<vmem>>, %arg15: memref<2x1x32xf32, #tpu.memory_space<vmem>>, %arg16: memref<2x1x32xf32, #tpu.memory_space<vmem>>, %arg17: memref<2x1x32xf32, #tpu.memory_space<vmem>>, %arg18: memref<32x8xf32, #tpu.memory_space<vmem>>, %arg19: memref<1x8xf32, #tpu.memory_space<vmem>>, %arg20: memref<1x8x8xf32, #tpu.memory_space<vmem>>) attributes {dimension_semantics = [#tpu.dimension_semantics<parallel>], iteration_bounds = array<i64: 2>, scalar_prefetch = 0 : i64, scratch_operands = 0 : i64, tpu.core_type = #tpu.core_type<tc>, window_params = [{transform_indices = @transform_0, window_bounds = array<i64: 1, 16, 8>}, {pipeline_mode = #tpu.pipeline_mode<synchronous>, transform_indices = @transform_1, window_bounds = array<i64: 3, 8>}, {pipeline_mode = #tpu.pipeline_mode<synchronous>, transform_indices = @transform_2, window_bounds = array<i64: 1, 8>}, {pipeline_mode = #tpu.pipeline_mode<synchronous>, transform_indices = @transform_3, window_bounds = array<i64: 8, 32>}, {pipeline_mode = #tpu.pipeline_mode<synchronous>, transform_indices = @transform_4, window_bounds = array<i64: 1, 32>}, {pipeline_mode = #tpu.pipeline_mode<synchronous>, transform_indices = @transform_5, window_bounds = array<i64: 2, 32, 96>}, {pipeline_mode = #tpu.pipeline_mode<synchronous>, transform_indices = @transform_6, window_bounds = array<i64: 2, 1, 96>}, {pipeline_mode = #tpu.pipeline_mode<synchronous>, transform_indices = @transform_7, window_bounds = array<i64: 2, 32, 32>}, {pipeline_mode = #tpu.pipeline_mode<synchronous>, transform_indices = @transform_8, window_bounds = array<i64: 2, 1, 32>}, {pipeline_mode = #tpu.pipeline_mode<synchronous>, transform_indices = @transform_9, window_bounds = array<i64: 2, 1, 32>}, {pipeline_mode = #tpu.pipeline_mode<synchronous>, transform_indices = @transform_10, window_bounds = array<i64: 2, 1, 32>}, {pipeline_mode = #tpu.pipeline_mode<synchronous>, transform_indices = @transform_11, window_bounds = array<i64: 2, 32, 64>}, {pipeline_mode = #tpu.pipeline_mode<synchronous>, transform_indices = @transform_12, window_bounds = array<i64: 2, 1, 64>}, {pipeline_mode = #tpu.pipeline_mode<synchronous>, transform_indices = @transform_13, window_bounds = array<i64: 2, 64, 32>}, {pipeline_mode = #tpu.pipeline_mode<synchronous>, transform_indices = @transform_14, window_bounds = array<i64: 2, 1, 32>}, {pipeline_mode = #tpu.pipeline_mode<synchronous>, transform_indices = @transform_15, window_bounds = array<i64: 2, 1, 32>}, {pipeline_mode = #tpu.pipeline_mode<synchronous>, transform_indices = @transform_16, window_bounds = array<i64: 2, 1, 32>}, {pipeline_mode = #tpu.pipeline_mode<synchronous>, transform_indices = @transform_17, window_bounds = array<i64: 32, 8>}, {pipeline_mode = #tpu.pipeline_mode<synchronous>, transform_indices = @transform_18, window_bounds = array<i64: 1, 8>}, {transform_indices = @transform_19, window_bounds = array<i64: 1, 8, 8>}]} {
    %c0 = arith.constant 0 : index
    %c0_0 = arith.constant 0 : index
    %c0_1 = arith.constant 0 : index
    %0 = vector.load %arg1[%c0, %c0_0, %c0_1] : memref<1x16x8xf32, #tpu.memory_space<vmem>>, vector<1x16x8xf32>
    %1 = vector.shape_cast %0 : vector<1x16x8xf32> to vector<16x8xf32>
    %c0_2 = arith.constant 0 : index
    %c0_3 = arith.constant 0 : index
    %2 = vector.load %arg2[%c0_2, %c0_3] : memref<3x8xf32, #tpu.memory_space<vmem>>, vector<3x8xf32>
    %cst = arith.constant 0.000000e+00 : f32
    %3 = vector.broadcast %cst : f32 to vector<14x8x8xf32>
    %4 = vector.extract_strided_slice %1 {offsets = [0, 0], sizes = [14, 8], strides = [1, 1]} : vector<16x8xf32> to vector<14x8xf32>
    %5 = vector.shape_cast %4 : vector<14x8xf32> to vector<14x8x1xf32>
    %6 = vector.extract_strided_slice %2 {offsets = [0, 0], sizes = [1, 8], strides = [1, 1]} : vector<3x8xf32> to vector<1x8xf32>
    %7 = vector.shape_cast %6 : vector<1x8xf32> to vector<8xf32>
    %8 = vector.shape_cast %7 : vector<8xf32> to vector<1x1x8xf32>
    %9 = vector.broadcast %5 : vector<14x8x1xf32> to vector<14x8x8xf32>
    %10 = vector.broadcast %8 : vector<1x1x8xf32> to vector<14x8x8xf32>
    %11 = arith.mulf %9, %10 : vector<14x8x8xf32>
    %12 = arith.addf %3, %11 : vector<14x8x8xf32>
    %13 = vector.extract_strided_slice %1 {offsets = [1, 0], sizes = [14, 8], strides = [1, 1]} : vector<16x8xf32> to vector<14x8xf32>
    %14 = vector.shape_cast %13 : vector<14x8xf32> to vector<14x8x1xf32>
    %15 = vector.extract_strided_slice %2 {offsets = [1, 0], sizes = [1, 8], strides = [1, 1]} : vector<3x8xf32> to vector<1x8xf32>
    %16 = vector.shape_cast %15 : vector<1x8xf32> to vector<8xf32>
    %17 = vector.shape_cast %16 : vector<8xf32> to vector<1x1x8xf32>
    %18 = vector.broadcast %14 : vector<14x8x1xf32> to vector<14x8x8xf32>
    %19 = vector.broadcast %17 : vector<1x1x8xf32> to vector<14x8x8xf32>
    %20 = arith.mulf %18, %19 : vector<14x8x8xf32>
    %21 = arith.addf %12, %20 : vector<14x8x8xf32>
    %22 = vector.extract_strided_slice %1 {offsets = [2, 0], sizes = [14, 8], strides = [1, 1]} : vector<16x8xf32> to vector<14x8xf32>
    %23 = vector.shape_cast %22 : vector<14x8xf32> to vector<14x8x1xf32>
    %24 = vector.extract_strided_slice %2 {offsets = [2, 0], sizes = [1, 8], strides = [1, 1]} : vector<3x8xf32> to vector<1x8xf32>
    %25 = vector.shape_cast %24 : vector<1x8xf32> to vector<8xf32>
    %26 = vector.shape_cast %25 : vector<8xf32> to vector<1x1x8xf32>
    %27 = vector.broadcast %23 : vector<14x8x1xf32> to vector<14x8x8xf32>
    %28 = vector.broadcast %26 : vector<1x1x8xf32> to vector<14x8x8xf32>
    %29 = arith.mulf %27, %28 : vector<14x8x8xf32>
    %30 = arith.addf %21, %29 : vector<14x8x8xf32>
    %cst_4 = arith.constant dense<0xFF800000> : vector<8x8xf32>
    %31 = vector.multi_reduction <maximumf>, %30, %cst_4 [0] : vector<14x8x8xf32> to vector<8x8xf32>
    %c0_5 = arith.constant 0 : index
    %c0_6 = arith.constant 0 : index
    %32 = vector.load %arg3[%c0_5, %c0_6] : memref<1x8xf32, #tpu.memory_space<vmem>>, vector<1x8xf32>
    %33 = vector.broadcast %32 : vector<1x8xf32> to vector<8x8xf32>
    %34 = arith.addf %31, %33 : vector<8x8xf32>
    %cst_7 = arith.constant 0.000000e+00 : f32
    %35 = vector.broadcast %cst_7 : f32 to vector<8x8xf32>
    %36 = arith.maximumf %34, %35 : vector<8x8xf32>
    %c0_8 = arith.constant 0 : index
    %c0_9 = arith.constant 0 : index
    %37 = vector.load %arg4[%c0_8, %c0_9] : memref<8x32xf32, #tpu.memory_space<vmem>>, vector<8x32xf32>
    %cst_10 = arith.constant dense<0.000000e+00> : vector<8x32xf32>
    %38 = tpu.matmul %36, %37, %cst_10 {dimension_numbers = #tpu.dot_dimension_numbers<[1], [0], [0], [1], [0, 0, 1, 1], [], []>} : vector<8x8xf32>, vector<8x32xf32>, vector<8x32xf32> -> vector<8x32xf32>
    %c0_11 = arith.constant 0 : index
    %c0_12 = arith.constant 0 : index
    %39 = vector.load %arg5[%c0_11, %c0_12] : memref<1x32xf32, #tpu.memory_space<vmem>>, vector<1x32xf32>
    %40 = vector.broadcast %39 : vector<1x32xf32> to vector<8x32xf32>
    %41 = arith.addf %38, %40 : vector<8x32xf32>
    %c0_13 = arith.constant 0 : index
    %c0_14 = arith.constant 0 : index
    %c0_15 = arith.constant 0 : index
    %42 = vector.load %arg6[%c0_13, %c0_14, %c0_15] : memref<2x32x96xf32, #tpu.memory_space<vmem>>, vector<1x32x96xf32>
    %43 = vector.shape_cast %42 : vector<1x32x96xf32> to vector<32x96xf32>
    %cst_16 = arith.constant dense<0.000000e+00> : vector<8x96xf32>
    %44 = tpu.matmul %41, %43, %cst_16 {dimension_numbers = #tpu.dot_dimension_numbers<[1], [0], [0], [1], [0, 0, 1, 1], [], []>} : vector<8x32xf32>, vector<32x96xf32>, vector<8x96xf32> -> vector<8x96xf32>
    %c0_17 = arith.constant 0 : index
    %c0_18 = arith.constant 0 : index
    %c0_19 = arith.constant 0 : index
    %45 = vector.load %arg7[%c0_17, %c0_18, %c0_19] : memref<2x1x96xf32, #tpu.memory_space<vmem>>, vector<1x1x96xf32>
    %46 = vector.shape_cast %45 : vector<1x1x96xf32> to vector<1x96xf32>
    %47 = vector.broadcast %46 : vector<1x96xf32> to vector<8x96xf32>
    %48 = arith.addf %44, %47 : vector<8x96xf32>
    %49 = vector.extract_strided_slice %48 {offsets = [0, 0], sizes = [8, 8], strides = [1, 1]} : vector<8x96xf32> to vector<8x8xf32>
    %cst_20 = arith.constant 0.353553385 : f32
    %50 = vector.broadcast %cst_20 : f32 to vector<8x8xf32>
    %51 = arith.mulf %49, %50 : vector<8x8xf32>
    %52 = vector.extract_strided_slice %48 {offsets = [0, 32], sizes = [8, 8], strides = [1, 1]} : vector<8x96xf32> to vector<8x8xf32>
    %53 = vector.extract_strided_slice %48 {offsets = [0, 64], sizes = [8, 8], strides = [1, 1]} : vector<8x96xf32> to vector<8x8xf32>
    %cst_21 = arith.constant dense<0.000000e+00> : vector<8x8xf32>
    %54 = tpu.matmul %51, %52, %cst_21 {dimension_numbers = #tpu.dot_dimension_numbers<[1], [1], [0], [0], [0, 0, 1, 0], [], []>} : vector<8x8xf32>, vector<8x8xf32>, vector<8x8xf32> -> vector<8x8xf32>
    %cst_22 = arith.constant dense<0xFF800000> : vector<8xf32>
    %55 = vector.multi_reduction <maximumf>, %54, %cst_22 [1] : vector<8x8xf32> to vector<8xf32>
    %56 = vector.shape_cast %55 : vector<8xf32> to vector<8x1xf32>
    %57 = vector.broadcast %56 : vector<8x1xf32> to vector<8x8xf32>
    %58 = arith.subf %54, %57 : vector<8x8xf32>
    %59 = math.exp %58 : vector<8x8xf32>
    %cst_23 = arith.constant dense<0.000000e+00> : vector<8xf32>
    %60 = vector.multi_reduction <add>, %59, %cst_23 [1] : vector<8x8xf32> to vector<8xf32>
    %61 = vector.shape_cast %60 : vector<8xf32> to vector<8x1xf32>
    %62 = tpu.reciprocal %61 {approx = true} : vector<8x1xf32> -> vector<8x1xf32>
    %63 = vector.broadcast %62 : vector<8x1xf32> to vector<8x8xf32>
    %64 = arith.mulf %59, %63 : vector<8x8xf32>
    %cst_24 = arith.constant dense<0.000000e+00> : vector<8x8xf32>
    %65 = tpu.matmul %64, %53, %cst_24 {dimension_numbers = #tpu.dot_dimension_numbers<[1], [0], [0], [1], [0, 0, 1, 1], [], []>} : vector<8x8xf32>, vector<8x8xf32>, vector<8x8xf32> -> vector<8x8xf32>
    %66 = vector.extract_strided_slice %48 {offsets = [0, 8], sizes = [8, 8], strides = [1, 1]} : vector<8x96xf32> to vector<8x8xf32>
    %cst_25 = arith.constant 0.353553385 : f32
    %67 = vector.broadcast %cst_25 : f32 to vector<8x8xf32>
    %68 = arith.mulf %66, %67 : vector<8x8xf32>
    %69 = vector.extract_strided_slice %48 {offsets = [0, 40], sizes = [8, 8], strides = [1, 1]} : vector<8x96xf32> to vector<8x8xf32>
    %70 = vector.extract_strided_slice %48 {offsets = [0, 72], sizes = [8, 8], strides = [1, 1]} : vector<8x96xf32> to vector<8x8xf32>
    %cst_26 = arith.constant dense<0.000000e+00> : vector<8x8xf32>
    %71 = tpu.matmul %68, %69, %cst_26 {dimension_numbers = #tpu.dot_dimension_numbers<[1], [1], [0], [0], [0, 0, 1, 0], [], []>} : vector<8x8xf32>, vector<8x8xf32>, vector<8x8xf32> -> vector<8x8xf32>
    %cst_27 = arith.constant dense<0xFF800000> : vector<8xf32>
    %72 = vector.multi_reduction <maximumf>, %71, %cst_27 [1] : vector<8x8xf32> to vector<8xf32>
    %73 = vector.shape_cast %72 : vector<8xf32> to vector<8x1xf32>
    %74 = vector.broadcast %73 : vector<8x1xf32> to vector<8x8xf32>
    %75 = arith.subf %71, %74 : vector<8x8xf32>
    %76 = math.exp %75 : vector<8x8xf32>
    %cst_28 = arith.constant dense<0.000000e+00> : vector<8xf32>
    %77 = vector.multi_reduction <add>, %76, %cst_28 [1] : vector<8x8xf32> to vector<8xf32>
    %78 = vector.shape_cast %77 : vector<8xf32> to vector<8x1xf32>
    %79 = tpu.reciprocal %78 {approx = true} : vector<8x1xf32> -> vector<8x1xf32>
    %80 = vector.broadcast %79 : vector<8x1xf32> to vector<8x8xf32>
    %81 = arith.mulf %76, %80 : vector<8x8xf32>
    %cst_29 = arith.constant dense<0.000000e+00> : vector<8x8xf32>
    %82 = tpu.matmul %81, %70, %cst_29 {dimension_numbers = #tpu.dot_dimension_numbers<[1], [0], [0], [1], [0, 0, 1, 1], [], []>} : vector<8x8xf32>, vector<8x8xf32>, vector<8x8xf32> -> vector<8x8xf32>
    %83 = vector.extract_strided_slice %48 {offsets = [0, 16], sizes = [8, 8], strides = [1, 1]} : vector<8x96xf32> to vector<8x8xf32>
    %cst_30 = arith.constant 0.353553385 : f32
    %84 = vector.broadcast %cst_30 : f32 to vector<8x8xf32>
    %85 = arith.mulf %83, %84 : vector<8x8xf32>
    %86 = vector.extract_strided_slice %48 {offsets = [0, 48], sizes = [8, 8], strides = [1, 1]} : vector<8x96xf32> to vector<8x8xf32>
    %87 = vector.extract_strided_slice %48 {offsets = [0, 80], sizes = [8, 8], strides = [1, 1]} : vector<8x96xf32> to vector<8x8xf32>
    %cst_31 = arith.constant dense<0.000000e+00> : vector<8x8xf32>
    %88 = tpu.matmul %85, %86, %cst_31 {dimension_numbers = #tpu.dot_dimension_numbers<[1], [1], [0], [0], [0, 0, 1, 0], [], []>} : vector<8x8xf32>, vector<8x8xf32>, vector<8x8xf32> -> vector<8x8xf32>
    %cst_32 = arith.constant dense<0xFF800000> : vector<8xf32>
    %89 = vector.multi_reduction <maximumf>, %88, %cst_32 [1] : vector<8x8xf32> to vector<8xf32>
    %90 = vector.shape_cast %89 : vector<8xf32> to vector<8x1xf32>
    %91 = vector.broadcast %90 : vector<8x1xf32> to vector<8x8xf32>
    %92 = arith.subf %88, %91 : vector<8x8xf32>
    %93 = math.exp %92 : vector<8x8xf32>
    %cst_33 = arith.constant dense<0.000000e+00> : vector<8xf32>
    %94 = vector.multi_reduction <add>, %93, %cst_33 [1] : vector<8x8xf32> to vector<8xf32>
    %95 = vector.shape_cast %94 : vector<8xf32> to vector<8x1xf32>
    %96 = tpu.reciprocal %95 {approx = true} : vector<8x1xf32> -> vector<8x1xf32>
    %97 = vector.broadcast %96 : vector<8x1xf32> to vector<8x8xf32>
    %98 = arith.mulf %93, %97 : vector<8x8xf32>
    %cst_34 = arith.constant dense<0.000000e+00> : vector<8x8xf32>
    %99 = tpu.matmul %98, %87, %cst_34 {dimension_numbers = #tpu.dot_dimension_numbers<[1], [0], [0], [1], [0, 0, 1, 1], [], []>} : vector<8x8xf32>, vector<8x8xf32>, vector<8x8xf32> -> vector<8x8xf32>
    %100 = vector.extract_strided_slice %48 {offsets = [0, 24], sizes = [8, 8], strides = [1, 1]} : vector<8x96xf32> to vector<8x8xf32>
    %cst_35 = arith.constant 0.353553385 : f32
    %101 = vector.broadcast %cst_35 : f32 to vector<8x8xf32>
    %102 = arith.mulf %100, %101 : vector<8x8xf32>
    %103 = vector.extract_strided_slice %48 {offsets = [0, 56], sizes = [8, 8], strides = [1, 1]} : vector<8x96xf32> to vector<8x8xf32>
    %104 = vector.extract_strided_slice %48 {offsets = [0, 88], sizes = [8, 8], strides = [1, 1]} : vector<8x96xf32> to vector<8x8xf32>
    %cst_36 = arith.constant dense<0.000000e+00> : vector<8x8xf32>
    %105 = tpu.matmul %102, %103, %cst_36 {dimension_numbers = #tpu.dot_dimension_numbers<[1], [1], [0], [0], [0, 0, 1, 0], [], []>} : vector<8x8xf32>, vector<8x8xf32>, vector<8x8xf32> -> vector<8x8xf32>
    %cst_37 = arith.constant dense<0xFF800000> : vector<8xf32>
    %106 = vector.multi_reduction <maximumf>, %105, %cst_37 [1] : vector<8x8xf32> to vector<8xf32>
    %107 = vector.shape_cast %106 : vector<8xf32> to vector<8x1xf32>
    %108 = vector.broadcast %107 : vector<8x1xf32> to vector<8x8xf32>
    %109 = arith.subf %105, %108 : vector<8x8xf32>
    %110 = math.exp %109 : vector<8x8xf32>
    %cst_38 = arith.constant dense<0.000000e+00> : vector<8xf32>
    %111 = vector.multi_reduction <add>, %110, %cst_38 [1] : vector<8x8xf32> to vector<8xf32>
    %112 = vector.shape_cast %111 : vector<8xf32> to vector<8x1xf32>
    %113 = tpu.reciprocal %112 {approx = true} : vector<8x1xf32> -> vector<8x1xf32>
    %114 = vector.broadcast %113 : vector<8x1xf32> to vector<8x8xf32>
    %115 = arith.mulf %110, %114 : vector<8x8xf32>
    %cst_39 = arith.constant dense<0.000000e+00> : vector<8x8xf32>
    %116 = tpu.matmul %115, %104, %cst_39 {dimension_numbers = #tpu.dot_dimension_numbers<[1], [0], [0], [1], [0, 0, 1, 1], [], []>} : vector<8x8xf32>, vector<8x8xf32>, vector<8x8xf32> -> vector<8x8xf32>
    %117 = tpu.concatenate %65, %82, %99, %116 in 1 : vector<8x8xf32>, vector<8x8xf32>, vector<8x8xf32>, vector<8x8xf32> -> vector<8x32xf32>
    %c0_40 = arith.constant 0 : index
    %c0_41 = arith.constant 0 : index
    %c0_42 = arith.constant 0 : index
    %118 = vector.load %arg8[%c0_40, %c0_41, %c0_42] : memref<2x32x32xf32, #tpu.memory_space<vmem>>, vector<1x32x32xf32>
    %119 = vector.shape_cast %118 : vector<1x32x32xf32> to vector<32x32xf32>
    %cst_43 = arith.constant dense<0.000000e+00> : vector<8x32xf32>
    %120 = tpu.matmul %117, %119, %cst_43 {dimension_numbers = #tpu.dot_dimension_numbers<[1], [0], [0], [1], [0, 0, 1, 1], [], []>} : vector<8x32xf32>, vector<32x32xf32>, vector<8x32xf32> -> vector<8x32xf32>
    %c0_44 = arith.constant 0 : index
    %c0_45 = arith.constant 0 : index
    %c0_46 = arith.constant 0 : index
    %121 = vector.load %arg9[%c0_44, %c0_45, %c0_46] : memref<2x1x32xf32, #tpu.memory_space<vmem>>, vector<1x1x32xf32>
    %122 = vector.shape_cast %121 : vector<1x1x32xf32> to vector<1x32xf32>
    %123 = vector.broadcast %122 : vector<1x32xf32> to vector<8x32xf32>
    %124 = arith.addf %120, %123 : vector<8x32xf32>
    %125 = arith.addf %124, %41 : vector<8x32xf32>
    %c0_47 = arith.constant 0 : index
    %c0_48 = arith.constant 0 : index
    %c0_49 = arith.constant 0 : index
    %126 = vector.load %arg10[%c0_47, %c0_48, %c0_49] : memref<2x1x32xf32, #tpu.memory_space<vmem>>, vector<1x1x32xf32>
    %127 = vector.shape_cast %126 : vector<1x1x32xf32> to vector<1x32xf32>
    %c0_50 = arith.constant 0 : index
    %c0_51 = arith.constant 0 : index
    %c0_52 = arith.constant 0 : index
    %128 = vector.load %arg11[%c0_50, %c0_51, %c0_52] : memref<2x1x32xf32, #tpu.memory_space<vmem>>, vector<1x1x32xf32>
    %129 = vector.shape_cast %128 : vector<1x1x32xf32> to vector<1x32xf32>
    %cst_53 = arith.constant dense<0.000000e+00> : vector<8xf32>
    %130 = vector.multi_reduction <add>, %125, %cst_53 [1] : vector<8x32xf32> to vector<8xf32>
    %131 = vector.shape_cast %130 : vector<8xf32> to vector<8x1xf32>
    %cst_54 = arith.constant 3.200000e+01 : f32
    %132 = vector.broadcast %cst_54 : f32 to vector<8x1xf32>
    %133 = arith.divf %131, %132 : vector<8x1xf32>
    %134 = vector.broadcast %133 : vector<8x1xf32> to vector<8x32xf32>
    %135 = arith.subf %125, %134 : vector<8x32xf32>
    %136 = arith.mulf %135, %135 : vector<8x32xf32>
    %cst_55 = arith.constant dense<0.000000e+00> : vector<8xf32>
    %137 = vector.multi_reduction <add>, %136, %cst_55 [1] : vector<8x32xf32> to vector<8xf32>
    %138 = vector.shape_cast %137 : vector<8xf32> to vector<8x1xf32>
    %cst_56 = arith.constant 3.200000e+01 : f32
    %139 = vector.broadcast %cst_56 : f32 to vector<8x1xf32>
    %140 = arith.divf %138, %139 : vector<8x1xf32>
    %141 = vector.broadcast %133 : vector<8x1xf32> to vector<8x32xf32>
    %142 = arith.subf %125, %141 : vector<8x32xf32>
    %cst_57 = arith.constant 9.99999974E-6 : f32
    %143 = vector.broadcast %cst_57 : f32 to vector<8x1xf32>
    %144 = arith.addf %140, %143 : vector<8x1xf32>
    %145 = math.rsqrt %144 : vector<8x1xf32>
    %146 = vector.broadcast %145 : vector<8x1xf32> to vector<8x32xf32>
    %147 = arith.mulf %142, %146 : vector<8x32xf32>
    %148 = vector.broadcast %127 : vector<1x32xf32> to vector<8x32xf32>
    %149 = arith.mulf %147, %148 : vector<8x32xf32>
    %150 = vector.broadcast %129 : vector<1x32xf32> to vector<8x32xf32>
    %151 = arith.addf %149, %150 : vector<8x32xf32>
    %c0_58 = arith.constant 0 : index
    %c0_59 = arith.constant 0 : index
    %c0_60 = arith.constant 0 : index
    %152 = vector.load %arg12[%c0_58, %c0_59, %c0_60] : memref<2x32x64xf32, #tpu.memory_space<vmem>>, vector<1x32x64xf32>
    %153 = vector.shape_cast %152 : vector<1x32x64xf32> to vector<32x64xf32>
    %cst_61 = arith.constant dense<0.000000e+00> : vector<8x64xf32>
    %154 = tpu.matmul %151, %153, %cst_61 {dimension_numbers = #tpu.dot_dimension_numbers<[1], [0], [0], [1], [0, 0, 1, 1], [], []>} : vector<8x32xf32>, vector<32x64xf32>, vector<8x64xf32> -> vector<8x64xf32>
    %c0_62 = arith.constant 0 : index
    %c0_63 = arith.constant 0 : index
    %c0_64 = arith.constant 0 : index
    %155 = vector.load %arg13[%c0_62, %c0_63, %c0_64] : memref<2x1x64xf32, #tpu.memory_space<vmem>>, vector<1x1x64xf32>
    %156 = vector.shape_cast %155 : vector<1x1x64xf32> to vector<1x64xf32>
    %157 = vector.broadcast %156 : vector<1x64xf32> to vector<8x64xf32>
    %158 = arith.addf %154, %157 : vector<8x64xf32>
    %cst_65 = arith.constant 0.000000e+00 : f32
    %159 = vector.broadcast %cst_65 : f32 to vector<8x64xf32>
    %160 = arith.maximumf %158, %159 : vector<8x64xf32>
    %c0_66 = arith.constant 0 : index
    %c0_67 = arith.constant 0 : index
    %c0_68 = arith.constant 0 : index
    %161 = vector.load %arg14[%c0_66, %c0_67, %c0_68] : memref<2x64x32xf32, #tpu.memory_space<vmem>>, vector<1x64x32xf32>
    %162 = vector.shape_cast %161 : vector<1x64x32xf32> to vector<64x32xf32>
    %cst_69 = arith.constant dense<0.000000e+00> : vector<8x32xf32>
    %163 = tpu.matmul %160, %162, %cst_69 {dimension_numbers = #tpu.dot_dimension_numbers<[1], [0], [0], [1], [0, 0, 1, 1], [], []>} : vector<8x64xf32>, vector<64x32xf32>, vector<8x32xf32> -> vector<8x32xf32>
    %c0_70 = arith.constant 0 : index
    %c0_71 = arith.constant 0 : index
    %c0_72 = arith.constant 0 : index
    %164 = vector.load %arg15[%c0_70, %c0_71, %c0_72] : memref<2x1x32xf32, #tpu.memory_space<vmem>>, vector<1x1x32xf32>
    %165 = vector.shape_cast %164 : vector<1x1x32xf32> to vector<1x32xf32>
    %166 = vector.broadcast %165 : vector<1x32xf32> to vector<8x32xf32>
    %167 = arith.addf %163, %166 : vector<8x32xf32>
    %168 = arith.addf %167, %151 : vector<8x32xf32>
    %c0_73 = arith.constant 0 : index
    %c0_74 = arith.constant 0 : index
    %c0_75 = arith.constant 0 : index
    %169 = vector.load %arg16[%c0_73, %c0_74, %c0_75] : memref<2x1x32xf32, #tpu.memory_space<vmem>>, vector<1x1x32xf32>
    %170 = vector.shape_cast %169 : vector<1x1x32xf32> to vector<1x32xf32>
    %c0_76 = arith.constant 0 : index
    %c0_77 = arith.constant 0 : index
    %c0_78 = arith.constant 0 : index
    %171 = vector.load %arg17[%c0_76, %c0_77, %c0_78] : memref<2x1x32xf32, #tpu.memory_space<vmem>>, vector<1x1x32xf32>
    %172 = vector.shape_cast %171 : vector<1x1x32xf32> to vector<1x32xf32>
    %cst_79 = arith.constant dense<0.000000e+00> : vector<8xf32>
    %173 = vector.multi_reduction <add>, %168, %cst_79 [1] : vector<8x32xf32> to vector<8xf32>
    %174 = vector.shape_cast %173 : vector<8xf32> to vector<8x1xf32>
    %cst_80 = arith.constant 3.200000e+01 : f32
    %175 = vector.broadcast %cst_80 : f32 to vector<8x1xf32>
    %176 = arith.divf %174, %175 : vector<8x1xf32>
    %177 = vector.broadcast %176 : vector<8x1xf32> to vector<8x32xf32>
    %178 = arith.subf %168, %177 : vector<8x32xf32>
    %179 = arith.mulf %178, %178 : vector<8x32xf32>
    %cst_81 = arith.constant dense<0.000000e+00> : vector<8xf32>
    %180 = vector.multi_reduction <add>, %179, %cst_81 [1] : vector<8x32xf32> to vector<8xf32>
    %181 = vector.shape_cast %180 : vector<8xf32> to vector<8x1xf32>
    %cst_82 = arith.constant 3.200000e+01 : f32
    %182 = vector.broadcast %cst_82 : f32 to vector<8x1xf32>
    %183 = arith.divf %181, %182 : vector<8x1xf32>
    %184 = vector.broadcast %176 : vector<8x1xf32> to vector<8x32xf32>
    %185 = arith.subf %168, %184 : vector<8x32xf32>
    %cst_83 = arith.constant 9.99999974E-6 : f32
    %186 = vector.broadcast %cst_83 : f32 to vector<8x1xf32>
    %187 = arith.addf %183, %186 : vector<8x1xf32>
    %188 = math.rsqrt %187 : vector<8x1xf32>
    %189 = vector.broadcast %188 : vector<8x1xf32> to vector<8x32xf32>
    %190 = arith.mulf %185, %189 : vector<8x32xf32>
    %191 = vector.broadcast %170 : vector<1x32xf32> to vector<8x32xf32>
    %192 = arith.mulf %190, %191 : vector<8x32xf32>
    %193 = vector.broadcast %172 : vector<1x32xf32> to vector<8x32xf32>
    %194 = arith.addf %192, %193 : vector<8x32xf32>
    %c1 = arith.constant 1 : index
    %c0_84 = arith.constant 0 : index
    %c0_85 = arith.constant 0 : index
    %195 = vector.load %arg6[%c1, %c0_84, %c0_85] : memref<2x32x96xf32, #tpu.memory_space<vmem>>, vector<1x32x96xf32>
    %196 = vector.shape_cast %195 : vector<1x32x96xf32> to vector<32x96xf32>
    %cst_86 = arith.constant dense<0.000000e+00> : vector<8x96xf32>
    %197 = tpu.matmul %194, %196, %cst_86 {dimension_numbers = #tpu.dot_dimension_numbers<[1], [0], [0], [1], [0, 0, 1, 1], [], []>} : vector<8x32xf32>, vector<32x96xf32>, vector<8x96xf32> -> vector<8x96xf32>
    %c1_87 = arith.constant 1 : index
    %c0_88 = arith.constant 0 : index
    %c0_89 = arith.constant 0 : index
    %198 = vector.load %arg7[%c1_87, %c0_88, %c0_89] : memref<2x1x96xf32, #tpu.memory_space<vmem>>, vector<1x1x96xf32>
    %199 = vector.shape_cast %198 : vector<1x1x96xf32> to vector<1x96xf32>
    %200 = vector.broadcast %199 : vector<1x96xf32> to vector<8x96xf32>
    %201 = arith.addf %197, %200 : vector<8x96xf32>
    %202 = vector.extract_strided_slice %201 {offsets = [0, 0], sizes = [8, 8], strides = [1, 1]} : vector<8x96xf32> to vector<8x8xf32>
    %cst_90 = arith.constant 0.353553385 : f32
    %203 = vector.broadcast %cst_90 : f32 to vector<8x8xf32>
    %204 = arith.mulf %202, %203 : vector<8x8xf32>
    %205 = vector.extract_strided_slice %201 {offsets = [0, 32], sizes = [8, 8], strides = [1, 1]} : vector<8x96xf32> to vector<8x8xf32>
    %206 = vector.extract_strided_slice %201 {offsets = [0, 64], sizes = [8, 8], strides = [1, 1]} : vector<8x96xf32> to vector<8x8xf32>
    %cst_91 = arith.constant dense<0.000000e+00> : vector<8x8xf32>
    %207 = tpu.matmul %204, %205, %cst_91 {dimension_numbers = #tpu.dot_dimension_numbers<[1], [1], [0], [0], [0, 0, 1, 0], [], []>} : vector<8x8xf32>, vector<8x8xf32>, vector<8x8xf32> -> vector<8x8xf32>
    %cst_92 = arith.constant dense<0xFF800000> : vector<8xf32>
    %208 = vector.multi_reduction <maximumf>, %207, %cst_92 [1] : vector<8x8xf32> to vector<8xf32>
    %209 = vector.shape_cast %208 : vector<8xf32> to vector<8x1xf32>
    %210 = vector.broadcast %209 : vector<8x1xf32> to vector<8x8xf32>
    %211 = arith.subf %207, %210 : vector<8x8xf32>
    %212 = math.exp %211 : vector<8x8xf32>
    %cst_93 = arith.constant dense<0.000000e+00> : vector<8xf32>
    %213 = vector.multi_reduction <add>, %212, %cst_93 [1] : vector<8x8xf32> to vector<8xf32>
    %214 = vector.shape_cast %213 : vector<8xf32> to vector<8x1xf32>
    %215 = tpu.reciprocal %214 {approx = true} : vector<8x1xf32> -> vector<8x1xf32>
    %216 = vector.broadcast %215 : vector<8x1xf32> to vector<8x8xf32>
    %217 = arith.mulf %212, %216 : vector<8x8xf32>
    %cst_94 = arith.constant dense<0.000000e+00> : vector<8x8xf32>
    %218 = tpu.matmul %217, %206, %cst_94 {dimension_numbers = #tpu.dot_dimension_numbers<[1], [0], [0], [1], [0, 0, 1, 1], [], []>} : vector<8x8xf32>, vector<8x8xf32>, vector<8x8xf32> -> vector<8x8xf32>
    %219 = vector.extract_strided_slice %201 {offsets = [0, 8], sizes = [8, 8], strides = [1, 1]} : vector<8x96xf32> to vector<8x8xf32>
    %cst_95 = arith.constant 0.353553385 : f32
    %220 = vector.broadcast %cst_95 : f32 to vector<8x8xf32>
    %221 = arith.mulf %219, %220 : vector<8x8xf32>
    %222 = vector.extract_strided_slice %201 {offsets = [0, 40], sizes = [8, 8], strides = [1, 1]} : vector<8x96xf32> to vector<8x8xf32>
    %223 = vector.extract_strided_slice %201 {offsets = [0, 72], sizes = [8, 8], strides = [1, 1]} : vector<8x96xf32> to vector<8x8xf32>
    %cst_96 = arith.constant dense<0.000000e+00> : vector<8x8xf32>
    %224 = tpu.matmul %221, %222, %cst_96 {dimension_numbers = #tpu.dot_dimension_numbers<[1], [1], [0], [0], [0, 0, 1, 0], [], []>} : vector<8x8xf32>, vector<8x8xf32>, vector<8x8xf32> -> vector<8x8xf32>
    %cst_97 = arith.constant dense<0xFF800000> : vector<8xf32>
    %225 = vector.multi_reduction <maximumf>, %224, %cst_97 [1] : vector<8x8xf32> to vector<8xf32>
    %226 = vector.shape_cast %225 : vector<8xf32> to vector<8x1xf32>
    %227 = vector.broadcast %226 : vector<8x1xf32> to vector<8x8xf32>
    %228 = arith.subf %224, %227 : vector<8x8xf32>
    %229 = math.exp %228 : vector<8x8xf32>
    %cst_98 = arith.constant dense<0.000000e+00> : vector<8xf32>
    %230 = vector.multi_reduction <add>, %229, %cst_98 [1] : vector<8x8xf32> to vector<8xf32>
    %231 = vector.shape_cast %230 : vector<8xf32> to vector<8x1xf32>
    %232 = tpu.reciprocal %231 {approx = true} : vector<8x1xf32> -> vector<8x1xf32>
    %233 = vector.broadcast %232 : vector<8x1xf32> to vector<8x8xf32>
    %234 = arith.mulf %229, %233 : vector<8x8xf32>
    %cst_99 = arith.constant dense<0.000000e+00> : vector<8x8xf32>
    %235 = tpu.matmul %234, %223, %cst_99 {dimension_numbers = #tpu.dot_dimension_numbers<[1], [0], [0], [1], [0, 0, 1, 1], [], []>} : vector<8x8xf32>, vector<8x8xf32>, vector<8x8xf32> -> vector<8x8xf32>
    %236 = vector.extract_strided_slice %201 {offsets = [0, 16], sizes = [8, 8], strides = [1, 1]} : vector<8x96xf32> to vector<8x8xf32>
    %cst_100 = arith.constant 0.353553385 : f32
    %237 = vector.broadcast %cst_100 : f32 to vector<8x8xf32>
    %238 = arith.mulf %236, %237 : vector<8x8xf32>
    %239 = vector.extract_strided_slice %201 {offsets = [0, 48], sizes = [8, 8], strides = [1, 1]} : vector<8x96xf32> to vector<8x8xf32>
    %240 = vector.extract_strided_slice %201 {offsets = [0, 80], sizes = [8, 8], strides = [1, 1]} : vector<8x96xf32> to vector<8x8xf32>
    %cst_101 = arith.constant dense<0.000000e+00> : vector<8x8xf32>
    %241 = tpu.matmul %238, %239, %cst_101 {dimension_numbers = #tpu.dot_dimension_numbers<[1], [1], [0], [0], [0, 0, 1, 0], [], []>} : vector<8x8xf32>, vector<8x8xf32>, vector<8x8xf32> -> vector<8x8xf32>
    %cst_102 = arith.constant dense<0xFF800000> : vector<8xf32>
    %242 = vector.multi_reduction <maximumf>, %241, %cst_102 [1] : vector<8x8xf32> to vector<8xf32>
    %243 = vector.shape_cast %242 : vector<8xf32> to vector<8x1xf32>
    %244 = vector.broadcast %243 : vector<8x1xf32> to vector<8x8xf32>
    %245 = arith.subf %241, %244 : vector<8x8xf32>
    %246 = math.exp %245 : vector<8x8xf32>
    %cst_103 = arith.constant dense<0.000000e+00> : vector<8xf32>
    %247 = vector.multi_reduction <add>, %246, %cst_103 [1] : vector<8x8xf32> to vector<8xf32>
    %248 = vector.shape_cast %247 : vector<8xf32> to vector<8x1xf32>
    %249 = tpu.reciprocal %248 {approx = true} : vector<8x1xf32> -> vector<8x1xf32>
    %250 = vector.broadcast %249 : vector<8x1xf32> to vector<8x8xf32>
    %251 = arith.mulf %246, %250 : vector<8x8xf32>
    %cst_104 = arith.constant dense<0.000000e+00> : vector<8x8xf32>
    %252 = tpu.matmul %251, %240, %cst_104 {dimension_numbers = #tpu.dot_dimension_numbers<[1], [0], [0], [1], [0, 0, 1, 1], [], []>} : vector<8x8xf32>, vector<8x8xf32>, vector<8x8xf32> -> vector<8x8xf32>
    %253 = vector.extract_strided_slice %201 {offsets = [0, 24], sizes = [8, 8], strides = [1, 1]} : vector<8x96xf32> to vector<8x8xf32>
    %cst_105 = arith.constant 0.353553385 : f32
    %254 = vector.broadcast %cst_105 : f32 to vector<8x8xf32>
    %255 = arith.mulf %253, %254 : vector<8x8xf32>
    %256 = vector.extract_strided_slice %201 {offsets = [0, 56], sizes = [8, 8], strides = [1, 1]} : vector<8x96xf32> to vector<8x8xf32>
    %257 = vector.extract_strided_slice %201 {offsets = [0, 88], sizes = [8, 8], strides = [1, 1]} : vector<8x96xf32> to vector<8x8xf32>
    %cst_106 = arith.constant dense<0.000000e+00> : vector<8x8xf32>
    %258 = tpu.matmul %255, %256, %cst_106 {dimension_numbers = #tpu.dot_dimension_numbers<[1], [1], [0], [0], [0, 0, 1, 0], [], []>} : vector<8x8xf32>, vector<8x8xf32>, vector<8x8xf32> -> vector<8x8xf32>
    %cst_107 = arith.constant dense<0xFF800000> : vector<8xf32>
    %259 = vector.multi_reduction <maximumf>, %258, %cst_107 [1] : vector<8x8xf32> to vector<8xf32>
    %260 = vector.shape_cast %259 : vector<8xf32> to vector<8x1xf32>
    %261 = vector.broadcast %260 : vector<8x1xf32> to vector<8x8xf32>
    %262 = arith.subf %258, %261 : vector<8x8xf32>
    %263 = math.exp %262 : vector<8x8xf32>
    %cst_108 = arith.constant dense<0.000000e+00> : vector<8xf32>
    %264 = vector.multi_reduction <add>, %263, %cst_108 [1] : vector<8x8xf32> to vector<8xf32>
    %265 = vector.shape_cast %264 : vector<8xf32> to vector<8x1xf32>
    %266 = tpu.reciprocal %265 {approx = true} : vector<8x1xf32> -> vector<8x1xf32>
    %267 = vector.broadcast %266 : vector<8x1xf32> to vector<8x8xf32>
    %268 = arith.mulf %263, %267 : vector<8x8xf32>
    %cst_109 = arith.constant dense<0.000000e+00> : vector<8x8xf32>
    %269 = tpu.matmul %268, %257, %cst_109 {dimension_numbers = #tpu.dot_dimension_numbers<[1], [0], [0], [1], [0, 0, 1, 1], [], []>} : vector<8x8xf32>, vector<8x8xf32>, vector<8x8xf32> -> vector<8x8xf32>
    %270 = tpu.concatenate %218, %235, %252, %269 in 1 : vector<8x8xf32>, vector<8x8xf32>, vector<8x8xf32>, vector<8x8xf32> -> vector<8x32xf32>
    %c1_110 = arith.constant 1 : index
    %c0_111 = arith.constant 0 : index
    %c0_112 = arith.constant 0 : index
    %271 = vector.load %arg8[%c1_110, %c0_111, %c0_112] : memref<2x32x32xf32, #tpu.memory_space<vmem>>, vector<1x32x32xf32>
    %272 = vector.shape_cast %271 : vector<1x32x32xf32> to vector<32x32xf32>
    %cst_113 = arith.constant dense<0.000000e+00> : vector<8x32xf32>
    %273 = tpu.matmul %270, %272, %cst_113 {dimension_numbers = #tpu.dot_dimension_numbers<[1], [0], [0], [1], [0, 0, 1, 1], [], []>} : vector<8x32xf32>, vector<32x32xf32>, vector<8x32xf32> -> vector<8x32xf32>
    %c1_114 = arith.constant 1 : index
    %c0_115 = arith.constant 0 : index
    %c0_116 = arith.constant 0 : index
    %274 = vector.load %arg9[%c1_114, %c0_115, %c0_116] : memref<2x1x32xf32, #tpu.memory_space<vmem>>, vector<1x1x32xf32>
    %275 = vector.shape_cast %274 : vector<1x1x32xf32> to vector<1x32xf32>
    %276 = vector.broadcast %275 : vector<1x32xf32> to vector<8x32xf32>
    %277 = arith.addf %273, %276 : vector<8x32xf32>
    %278 = arith.addf %277, %194 : vector<8x32xf32>
    %c1_117 = arith.constant 1 : index
    %c0_118 = arith.constant 0 : index
    %c0_119 = arith.constant 0 : index
    %279 = vector.load %arg10[%c1_117, %c0_118, %c0_119] : memref<2x1x32xf32, #tpu.memory_space<vmem>>, vector<1x1x32xf32>
    %280 = vector.shape_cast %279 : vector<1x1x32xf32> to vector<1x32xf32>
    %c1_120 = arith.constant 1 : index
    %c0_121 = arith.constant 0 : index
    %c0_122 = arith.constant 0 : index
    %281 = vector.load %arg11[%c1_120, %c0_121, %c0_122] : memref<2x1x32xf32, #tpu.memory_space<vmem>>, vector<1x1x32xf32>
    %282 = vector.shape_cast %281 : vector<1x1x32xf32> to vector<1x32xf32>
    %cst_123 = arith.constant dense<0.000000e+00> : vector<8xf32>
    %283 = vector.multi_reduction <add>, %278, %cst_123 [1] : vector<8x32xf32> to vector<8xf32>
    %284 = vector.shape_cast %283 : vector<8xf32> to vector<8x1xf32>
    %cst_124 = arith.constant 3.200000e+01 : f32
    %285 = vector.broadcast %cst_124 : f32 to vector<8x1xf32>
    %286 = arith.divf %284, %285 : vector<8x1xf32>
    %287 = vector.broadcast %286 : vector<8x1xf32> to vector<8x32xf32>
    %288 = arith.subf %278, %287 : vector<8x32xf32>
    %289 = arith.mulf %288, %288 : vector<8x32xf32>
    %cst_125 = arith.constant dense<0.000000e+00> : vector<8xf32>
    %290 = vector.multi_reduction <add>, %289, %cst_125 [1] : vector<8x32xf32> to vector<8xf32>
    %291 = vector.shape_cast %290 : vector<8xf32> to vector<8x1xf32>
    %cst_126 = arith.constant 3.200000e+01 : f32
    %292 = vector.broadcast %cst_126 : f32 to vector<8x1xf32>
    %293 = arith.divf %291, %292 : vector<8x1xf32>
    %294 = vector.broadcast %286 : vector<8x1xf32> to vector<8x32xf32>
    %295 = arith.subf %278, %294 : vector<8x32xf32>
    %cst_127 = arith.constant 9.99999974E-6 : f32
    %296 = vector.broadcast %cst_127 : f32 to vector<8x1xf32>
    %297 = arith.addf %293, %296 : vector<8x1xf32>
    %298 = math.rsqrt %297 : vector<8x1xf32>
    %299 = vector.broadcast %298 : vector<8x1xf32> to vector<8x32xf32>
    %300 = arith.mulf %295, %299 : vector<8x32xf32>
    %301 = vector.broadcast %280 : vector<1x32xf32> to vector<8x32xf32>
    %302 = arith.mulf %300, %301 : vector<8x32xf32>
    %303 = vector.broadcast %282 : vector<1x32xf32> to vector<8x32xf32>
    %304 = arith.addf %302, %303 : vector<8x32xf32>
    %c1_128 = arith.constant 1 : index
    %c0_129 = arith.constant 0 : index
    %c0_130 = arith.constant 0 : index
    %305 = vector.load %arg12[%c1_128, %c0_129, %c0_130] : memref<2x32x64xf32, #tpu.memory_space<vmem>>, vector<1x32x64xf32>
    %306 = vector.shape_cast %305 : vector<1x32x64xf32> to vector<32x64xf32>
    %cst_131 = arith.constant dense<0.000000e+00> : vector<8x64xf32>
    %307 = tpu.matmul %304, %306, %cst_131 {dimension_numbers = #tpu.dot_dimension_numbers<[1], [0], [0], [1], [0, 0, 1, 1], [], []>} : vector<8x32xf32>, vector<32x64xf32>, vector<8x64xf32> -> vector<8x64xf32>
    %c1_132 = arith.constant 1 : index
    %c0_133 = arith.constant 0 : index
    %c0_134 = arith.constant 0 : index
    %308 = vector.load %arg13[%c1_132, %c0_133, %c0_134] : memref<2x1x64xf32, #tpu.memory_space<vmem>>, vector<1x1x64xf32>
    %309 = vector.shape_cast %308 : vector<1x1x64xf32> to vector<1x64xf32>
    %310 = vector.broadcast %309 : vector<1x64xf32> to vector<8x64xf32>
    %311 = arith.addf %307, %310 : vector<8x64xf32>
    %cst_135 = arith.constant 0.000000e+00 : f32
    %312 = vector.broadcast %cst_135 : f32 to vector<8x64xf32>
    %313 = arith.maximumf %311, %312 : vector<8x64xf32>
    %c1_136 = arith.constant 1 : index
    %c0_137 = arith.constant 0 : index
    %c0_138 = arith.constant 0 : index
    %314 = vector.load %arg14[%c1_136, %c0_137, %c0_138] : memref<2x64x32xf32, #tpu.memory_space<vmem>>, vector<1x64x32xf32>
    %315 = vector.shape_cast %314 : vector<1x64x32xf32> to vector<64x32xf32>
    %cst_139 = arith.constant dense<0.000000e+00> : vector<8x32xf32>
    %316 = tpu.matmul %313, %315, %cst_139 {dimension_numbers = #tpu.dot_dimension_numbers<[1], [0], [0], [1], [0, 0, 1, 1], [], []>} : vector<8x64xf32>, vector<64x32xf32>, vector<8x32xf32> -> vector<8x32xf32>
    %c1_140 = arith.constant 1 : index
    %c0_141 = arith.constant 0 : index
    %c0_142 = arith.constant 0 : index
    %317 = vector.load %arg15[%c1_140, %c0_141, %c0_142] : memref<2x1x32xf32, #tpu.memory_space<vmem>>, vector<1x1x32xf32>
    %318 = vector.shape_cast %317 : vector<1x1x32xf32> to vector<1x32xf32>
    %319 = vector.broadcast %318 : vector<1x32xf32> to vector<8x32xf32>
    %320 = arith.addf %316, %319 : vector<8x32xf32>
    %321 = arith.addf %320, %304 : vector<8x32xf32>
    %c1_143 = arith.constant 1 : index
    %c0_144 = arith.constant 0 : index
    %c0_145 = arith.constant 0 : index
    %322 = vector.load %arg16[%c1_143, %c0_144, %c0_145] : memref<2x1x32xf32, #tpu.memory_space<vmem>>, vector<1x1x32xf32>
    %323 = vector.shape_cast %322 : vector<1x1x32xf32> to vector<1x32xf32>
    %c1_146 = arith.constant 1 : index
    %c0_147 = arith.constant 0 : index
    %c0_148 = arith.constant 0 : index
    %324 = vector.load %arg17[%c1_146, %c0_147, %c0_148] : memref<2x1x32xf32, #tpu.memory_space<vmem>>, vector<1x1x32xf32>
    %325 = vector.shape_cast %324 : vector<1x1x32xf32> to vector<1x32xf32>
    %cst_149 = arith.constant dense<0.000000e+00> : vector<8xf32>
    %326 = vector.multi_reduction <add>, %321, %cst_149 [1] : vector<8x32xf32> to vector<8xf32>
    %327 = vector.shape_cast %326 : vector<8xf32> to vector<8x1xf32>
    %cst_150 = arith.constant 3.200000e+01 : f32
    %328 = vector.broadcast %cst_150 : f32 to vector<8x1xf32>
    %329 = arith.divf %327, %328 : vector<8x1xf32>
    %330 = vector.broadcast %329 : vector<8x1xf32> to vector<8x32xf32>
    %331 = arith.subf %321, %330 : vector<8x32xf32>
    %332 = arith.mulf %331, %331 : vector<8x32xf32>
    %cst_151 = arith.constant dense<0.000000e+00> : vector<8xf32>
    %333 = vector.multi_reduction <add>, %332, %cst_151 [1] : vector<8x32xf32> to vector<8xf32>
    %334 = vector.shape_cast %333 : vector<8xf32> to vector<8x1xf32>
    %cst_152 = arith.constant 3.200000e+01 : f32
    %335 = vector.broadcast %cst_152 : f32 to vector<8x1xf32>
    %336 = arith.divf %334, %335 : vector<8x1xf32>
    %337 = vector.broadcast %329 : vector<8x1xf32> to vector<8x32xf32>
    %338 = arith.subf %321, %337 : vector<8x32xf32>
    %cst_153 = arith.constant 9.99999974E-6 : f32
    %339 = vector.broadcast %cst_153 : f32 to vector<8x1xf32>
    %340 = arith.addf %336, %339 : vector<8x1xf32>
    %341 = math.rsqrt %340 : vector<8x1xf32>
    %342 = vector.broadcast %341 : vector<8x1xf32> to vector<8x32xf32>
    %343 = arith.mulf %338, %342 : vector<8x32xf32>
    %344 = vector.broadcast %323 : vector<1x32xf32> to vector<8x32xf32>
    %345 = arith.mulf %343, %344 : vector<8x32xf32>
    %346 = vector.broadcast %325 : vector<1x32xf32> to vector<8x32xf32>
    %347 = arith.addf %345, %346 : vector<8x32xf32>
    %c0_154 = arith.constant 0 : index
    %c0_155 = arith.constant 0 : index
    %348 = vector.load %arg18[%c0_154, %c0_155] : memref<32x8xf32, #tpu.memory_space<vmem>>, vector<32x8xf32>
    %cst_156 = arith.constant dense<0.000000e+00> : vector<8x8xf32>
    %349 = tpu.matmul %347, %348, %cst_156 {dimension_numbers = #tpu.dot_dimension_numbers<[1], [0], [0], [1], [0, 0, 1, 1], [], []>} : vector<8x32xf32>, vector<32x8xf32>, vector<8x8xf32> -> vector<8x8xf32>
    %c0_157 = arith.constant 0 : index
    %c0_158 = arith.constant 0 : index
    %350 = vector.load %arg19[%c0_157, %c0_158] : memref<1x8xf32, #tpu.memory_space<vmem>>, vector<1x8xf32>
    %351 = vector.broadcast %350 : vector<1x8xf32> to vector<8x8xf32>
    %352 = arith.addf %349, %351 : vector<8x8xf32>
    %c0_159 = arith.constant 0 : index
    %c0_160 = arith.constant 0 : index
    %c0_161 = arith.constant 0 : index
    %353 = vector.load %arg20[%c0_159, %c0_160, %c0_161] : memref<1x8x8xf32, #tpu.memory_space<vmem>>, vector<1x8x8xf32>
    %354 = vector.shape_cast %353 : vector<1x8x8xf32> to vector<8x8xf32>
    %355 = vector.shape_cast %352 : vector<8x8xf32> to vector<1x8x8xf32>
    tpu.vector_store %arg20[%c0_159, %c0_160, %c0_161], %355 {strides = array<i32>} : memref<1x8x8xf32, #tpu.memory_space<vmem>>, vector<1x8x8xf32>,
    return
  }
  func.func @transform_0(%arg0: i32) -> (i32, i32, i32) {
    %c0_i32 = arith.constant 0 : i32
    %c0_i32_0 = arith.constant 0 : i32
    %c0_i32_1 = arith.constant 0 : i32
    return %arg0, %c0_i32, %c0_i32_0 : i32, i32, i32
  }
  func.func @transform_1(%arg0: i32) -> (i32, i32) {
    %c0_i32 = arith.constant 0 : i32
    %c0_i32_0 = arith.constant 0 : i32
    %c0_i32_1 = arith.constant 0 : i32
    return %c0_i32, %c0_i32_0 : i32, i32
  }
  func.func @transform_2(%arg0: i32) -> (i32, i32) {
    %c0_i32 = arith.constant 0 : i32
    %c0_i32_0 = arith.constant 0 : i32
    %c0_i32_1 = arith.constant 0 : i32
    return %c0_i32, %c0_i32_0 : i32, i32
  }
  func.func @transform_3(%arg0: i32) -> (i32, i32) {
    %c0_i32 = arith.constant 0 : i32
    %c0_i32_0 = arith.constant 0 : i32
    %c0_i32_1 = arith.constant 0 : i32
    return %c0_i32, %c0_i32_0 : i32, i32
  }
  func.func @transform_4(%arg0: i32) -> (i32, i32) {
    %c0_i32 = arith.constant 0 : i32
    %c0_i32_0 = arith.constant 0 : i32
    %c0_i32_1 = arith.constant 0 : i32
    return %c0_i32, %c0_i32_0 : i32, i32
  }
  func.func @transform_5(%arg0: i32) -> (i32, i32, i32) {
    %c0_i32 = arith.constant 0 : i32
    %c0_i32_0 = arith.constant 0 : i32
    %c0_i32_1 = arith.constant 0 : i32
    %c0_i32_2 = arith.constant 0 : i32
    return %c0_i32, %c0_i32_0, %c0_i32_1 : i32, i32, i32
  }
  func.func @transform_6(%arg0: i32) -> (i32, i32, i32) {
    %c0_i32 = arith.constant 0 : i32
    %c0_i32_0 = arith.constant 0 : i32
    %c0_i32_1 = arith.constant 0 : i32
    %c0_i32_2 = arith.constant 0 : i32
    return %c0_i32, %c0_i32_0, %c0_i32_1 : i32, i32, i32
  }
  func.func @transform_7(%arg0: i32) -> (i32, i32, i32) {
    %c0_i32 = arith.constant 0 : i32
    %c0_i32_0 = arith.constant 0 : i32
    %c0_i32_1 = arith.constant 0 : i32
    %c0_i32_2 = arith.constant 0 : i32
    return %c0_i32, %c0_i32_0, %c0_i32_1 : i32, i32, i32
  }
  func.func @transform_8(%arg0: i32) -> (i32, i32, i32) {
    %c0_i32 = arith.constant 0 : i32
    %c0_i32_0 = arith.constant 0 : i32
    %c0_i32_1 = arith.constant 0 : i32
    %c0_i32_2 = arith.constant 0 : i32
    return %c0_i32, %c0_i32_0, %c0_i32_1 : i32, i32, i32
  }
  func.func @transform_9(%arg0: i32) -> (i32, i32, i32) {
    %c0_i32 = arith.constant 0 : i32
    %c0_i32_0 = arith.constant 0 : i32
    %c0_i32_1 = arith.constant 0 : i32
    %c0_i32_2 = arith.constant 0 : i32
    return %c0_i32, %c0_i32_0, %c0_i32_1 : i32, i32, i32
  }
  func.func @transform_10(%arg0: i32) -> (i32, i32, i32) {
    %c0_i32 = arith.constant 0 : i32
    %c0_i32_0 = arith.constant 0 : i32
    %c0_i32_1 = arith.constant 0 : i32
    %c0_i32_2 = arith.constant 0 : i32
    return %c0_i32, %c0_i32_0, %c0_i32_1 : i32, i32, i32
  }
  func.func @transform_11(%arg0: i32) -> (i32, i32, i32) {
    %c0_i32 = arith.constant 0 : i32
    %c0_i32_0 = arith.constant 0 : i32
    %c0_i32_1 = arith.constant 0 : i32
    %c0_i32_2 = arith.constant 0 : i32
    return %c0_i32, %c0_i32_0, %c0_i32_1 : i32, i32, i32
  }
  func.func @transform_12(%arg0: i32) -> (i32, i32, i32) {
    %c0_i32 = arith.constant 0 : i32
    %c0_i32_0 = arith.constant 0 : i32
    %c0_i32_1 = arith.constant 0 : i32
    %c0_i32_2 = arith.constant 0 : i32
    return %c0_i32, %c0_i32_0, %c0_i32_1 : i32, i32, i32
  }
  func.func @transform_13(%arg0: i32) -> (i32, i32, i32) {
    %c0_i32 = arith.constant 0 : i32
    %c0_i32_0 = arith.constant 0 : i32
    %c0_i32_1 = arith.constant 0 : i32
    %c0_i32_2 = arith.constant 0 : i32
    return %c0_i32, %c0_i32_0, %c0_i32_1 : i32, i32, i32
  }
  func.func @transform_14(%arg0: i32) -> (i32, i32, i32) {
    %c0_i32 = arith.constant 0 : i32
    %c0_i32_0 = arith.constant 0 : i32
    %c0_i32_1 = arith.constant 0 : i32
    %c0_i32_2 = arith.constant 0 : i32
    return %c0_i32, %c0_i32_0, %c0_i32_1 : i32, i32, i32
  }
  func.func @transform_15(%arg0: i32) -> (i32, i32, i32) {
    %c0_i32 = arith.constant 0 : i32
    %c0_i32_0 = arith.constant 0 : i32
    %c0_i32_1 = arith.constant 0 : i32
    %c0_i32_2 = arith.constant 0 : i32
    return %c0_i32, %c0_i32_0, %c0_i32_1 : i32, i32, i32
  }
  func.func @transform_16(%arg0: i32) -> (i32, i32, i32) {
    %c0_i32 = arith.constant 0 : i32
    %c0_i32_0 = arith.constant 0 : i32
    %c0_i32_1 = arith.constant 0 : i32
    %c0_i32_2 = arith.constant 0 : i32
    return %c0_i32, %c0_i32_0, %c0_i32_1 : i32, i32, i32
  }
  func.func @transform_17(%arg0: i32) -> (i32, i32) {
    %c0_i32 = arith.constant 0 : i32
    %c0_i32_0 = arith.constant 0 : i32
    %c0_i32_1 = arith.constant 0 : i32
    return %c0_i32, %c0_i32_0 : i32, i32
  }
  func.func @transform_18(%arg0: i32) -> (i32, i32) {
    %c0_i32 = arith.constant 0 : i32
    %c0_i32_0 = arith.constant 0 : i32
    %c0_i32_1 = arith.constant 0 : i32
    return %c0_i32, %c0_i32_0 : i32, i32
  }
  func.func @transform_19(%arg0: i32) -> (i32, i32, i32) {
    %c0_i32 = arith.constant 0 : i32
    %c0_i32_0 = arith.constant 0 : i32
    %c0_i32_1 = arith.constant 0 : i32
    return %arg0, %c0_i32, %c0_i32_0 : i32, i32, i32
  }
}

</mosaic_0001>

<bundles_post_ra>
// kernel: forward.1
= control target key start
LH: loop header
LB: loop body
LE: loop exit
PB: predicated region body
PF: predicated region fallthrough
CT: control target
= control target key end

     0   :  { %s4562_s0 = inlined_call_operand.vmem [shape: f32[2,16,8], index: 0, kind: input, shape index: {}]   ;;  %s4563_s1 = inlined_call_operand.vmem [shape: f32[3,8], index: 1, kind: input, shape index: {}]   ;;  %s4564_s2 = inlined_call_operand.vmem [shape: f32[1,8], index: 2, kind: input, shape index: {}]   ;;  %s4565_s3 = inlined_call_operand.vmem [shape: f32[8,32], index: 3, kind: input, shape index: {}]   ;;  %s4566_s4 = inlined_call_operand.vmem [shape: f32[1,32], index: 4, kind: input, shape index: {}]   ;;  %s4567_s5 = inlined_call_operand.vmem [shape: f32[2,32,96], index: 5, kind: input, shape index: {}]   ;;  %s4568_s6 = inlined_call_operand.vmem [shape: f32[2,1,96], index: 6, kind: input, shape index: {}]   ;;  %s4569_s7 = inlined_call_operand.vmem [shape: f32[2,32,32], index: 7, kind: input, shape index: {}]   ;;  %s4570_s8 = inlined_call_operand.vmem [shape: f32[2,1,32], index: 8, kind: input, shape index: {}]   ;;  %s4571_s9 = inlined_call_operand.vmem [shape: f32[2,1,32], index: 9, kind: input, shape index: {}]   ;;  %s4572_s10 = inlined_call_operand.vmem [shape: f32[2,1,32], index: 10, kind: input, shape index: {}]   ;;  %s4573_s11 = inlined_call_operand.vmem [shape: f32[2,32,64], index: 11, kind: input, shape index: {}]   ;;  %s4574_s12 = inlined_call_operand.vmem [shape: f32[2,1,64], index: 12, kind: input, shape index: {}]   ;;  %s4575_s13 = inlined_call_operand.vmem [shape: f32[2,64,32], index: 13, kind: input, shape index: {}]   ;;  %s4576_s14 = inlined_call_operand.vmem [shape: f32[2,1,32], index: 14, kind: input, shape index: {}]   ;;  %s4577_s15 = inlined_call_operand.vmem [shape: f32[2,1,32], index: 15, kind: input, shape index: {}]   ;;  %s4578_s16 = inlined_call_operand.vmem [shape: f32[2,1,32], index: 16, kind: input, shape index: {}]   ;;  %s4579_s17 = inlined_call_operand.vmem [shape: f32[32,8], index: 17, kind: input, shape index: {}]   ;;  %s4580_s18 = inlined_call_operand.vmem [shape: f32[1,8], index: 18, kind: input, shape index: {}]   ;;  %s4581_s19 = inlined_call_operand.hbm [shape: f32[2,8,8], index: 19, kind: output, shape index: {}]  }
   0x1   :  { %4597 = sst [smem:[#allocation7_spill]] %s4562_s0 }
   0x2   :  { %4598 = sst [smem:[#allocation8_spill]] %s4563_s1 }
   0x3   :  { %4599 = sst [smem:[#allocation9_spill]] %s4564_s2 }
   0x4   :  { %4600 = sst [smem:[#allocation10_spill]] %s4565_s3 }
   0x5   :  { %4601 = sst [smem:[#allocation11_spill]] %s4566_s4 }
   0x6   :  { %4602 = sst [smem:[#allocation12_spill]] %s4567_s5 }
   0x7   :  { %4603 = sst [smem:[#allocation13_spill]] %s4568_s6 }
   0x8   :  { %24 = vsyncpa [#allocation3], 0 }
   0x9   :  { %26 = vsyncpa [#allocation3 + $0x1], 0  ;;  %s3983_s0 = smov 0   ;;  %s3985_s30 = smov 0  }
   0xa   :  { %s3987_s20 = smov 0   ;;  %s3989_s21 = smov 0  }
   0xb LB: > { %4604 = sst [smem:[#allocation5_spill]] %s3859_s20  ;;  %s4004_s1 = sadd.s32 4294967295, %s3863_s21   ;;  %s3863_s21 = sphi %s3989_s21, %s4633_s21   ;;  %s3859_s20 = sphi %s3987_s20, %s4630_s20   ;;  %s3855_s30 = sphi %s3985_s30, %s4632_s30   ;;  %s3851_s0 = sphi %s3983_s0, %s4631_s0  }
   0xc   : > { %s3259_s22 = sadd.s32 4294967294, %s3863_s21   ;;  %s4008_s2 = sadd.s32 1, %s3863_s21  }
   0xd   : > { %s443_s23 = sadd.s32 1, %s3859_s20  ;;  %s440_s24 = ssub.s32 %s3863_s21, %s4008_s2 }
   0xe   : > { %p453_p0 = scmp.ne.s32.totalorder %s3859_s20, %s3855_s30  ;;  %p441_p1 = scmp.eq.s32.totalorder %s440_s24, 0 }
   0xf   : > { %p454_p2 = scmp.eq.s32.totalorder %s4004_s1, 1  ;;  %p459_p3 = scmp.ne.s32.totalorder %s3855_s30, %s3851_s0 }
  0x10   : > { %p460_p4 = scmp.eq.s32.totalorder %s3259_s22, 1  ;;  %p3262_p7 = scmp.ge.s32.totalorder %s3863_s21, 1 }
  0x11   : > { %s4019_s25 = scalar_select %p441_p1, %s3859_s20, %s443_s23  }
  0x12   : > { %p4021_p5 = por %p454_p2, %p453_p0  ;;  %p4025_p6 = por %p460_p4, %p459_p3 }
  0x13   : > { %4605 = sst [smem:[#allocation6_spill]] %s4019_s25  ;;  %p540_p8 = scmp.lt.s32.totalorder %s3863_s21, 3 }
  0x15   : > { %p541_p9 = pnand %p3262_p7, %p540_p8 }
  0x16   : > { %p596_p10 = scmp.lt.s32.totalorder (!%p541_p9), %s4004_s1, 1  ;;  %v604_v0 = vlaneseq (!%p541_p9)  ;;  %s4608_s23 = sld [smem:[#allocation7_spill]] (!%p541_p9)  ;;  %v3865_v29 = vmov (!%p541_p9), 0.0   ;;  %vm3866_vm0 = vmmov (!%p541_p9), 0   ;;  %v3867_v32 = vmov (!%p541_p9), 0.0|0.0  }
  0x17   : > { %544 = sbr.rel (%p541_p9) target bundleno = 6162 (0x1812), region = 96  ;;  %s4609_s29 = sld [smem:[#allocation10_spill]] (!%p541_p9)  ;;  %3439 = vmatprep.subr.mxu0 (!%p541_p9), %v3865_v29  ;;  %3441 = vmatprep.mubr.msk.f32.mxu0 (!%p541_p9), %vm3866_vm0, %v3865_v29  ;;  %vm812_vm1 = vcmask (!%p541_p9), 64512   ;;  %vm941_vm2 = vcmask (!%p541_p9), 261120   ;;  %vm1689_vm3 = vcmask (!%p541_p9), 130048   ;;  %vm1691_vm4 = vcmask (!%p541_p9), 195584  }
  0x18   : > { %v605_v1 = vshrl.u32 (!%p541_p9), %v604_v0, 7  ;;  %3452 = vmatprep.mubr.msk.f32.mxu1 (!%p541_p9), %vm3866_vm0, %v3865_v29  ;;  %s4610_s5 = sld [smem:[#allocation12_spill]] (!%p541_p9)  ;;  %3639 = vmatprep.subr.bf16.mxu1 (!%p541_p9), %v3867_v32  ;;  %s4611_s25 = sld [smem:[#allocation8_spill]] (!%p541_p9)  ;;  %vm1908_vm5 = vcmask (!%p541_p9), 523264  }
  0x19   : > { %s4613_s4 = sld [smem:[#allocation11_spill]] (!%p541_p9)  ;;  %s4614_s6 = sld [smem:[#allocation13_spill]] (!%p541_p9) }
  0x1a   : > { %v4033_v2 = vsub.s32 (!%p541_p9), 2, %v605_v1  ;;  %v606_v3 = vsub.s32 (!%p541_p9), 0, %v605_v1  ;;  %v634_v4 = vsub.s32 (!%p541_p9), 4, %v605_v1  ;;  %v613_v5 = vsub.s32 (!%p541_p9), 1, %v605_v1  ;;  %s4589_s22 = smov (!%p541_p9), 104   ;;  %s4621_s20 = smov (!%p541_p9), 72  }
  0x1b   : > { %v648_v11 = vsub.s32 (!%p541_p9), 6, %v605_v1  ;;  %v641_v12 = vsub.s32 (!%p541_p9), 5, %v605_v1  ;;  %v655_v15 = vsub.s32 (!%p541_p9), 7, %v605_v1  ;;  %v627_v16 = vsub.s32 (!%p541_p9), 3, %v605_v1 }
  0x1d   : > { %v849_v28 = vld [vmem:[%s4609_s29] sm:$0xff] (!%p541_p9)  ;;  %s4582_s29 = smov (!%p541_p9), 120  }
  0x1e   : > { %s597_s27 = scalar_select %p596_p10, %s4004_s1, 1  ;;  %3440 = vmatpush3.msra.mxu0 %v849_v28  ;;  %v930_v30 = vld [vmem:[%s4610_s5] sm:$0xff]  ;;  %v931_v31 = vld [vmem:[%s4610_s5 + $0x8] sm:$0xff] }
  0x1f   : > { %3455 = vmatprep.subr.mxu0 %v3865_v29  ;;  %v3640_v33 = vpack.c.bf16 %v931_v31, %v930_v30  ;;  %v603_v34 = vld [vmem:[%s4611_s25] sm:$0x7]  ;;  %s4590_s25 = smov 112  }
  0x20   : > { %s3351_s28 = sshll.u32 %s597_s27, 4  ;;  %v4060_v37 = vrot.slane %v603_v34, %v613_v5  ;;  %v4062_v38 = vrot.slane %v603_v34, %v606_v3  ;;  %v4065_v39 = vrot.slane %v603_v34, %v4033_v2  ;;  %s4591_s27 = smov 96  }
  0x21   : > { %s600_s24 = scalar_lea.vmem %s4608_s23, %s3351_s28  ;;  %3641 = vmatpush3.bf16.msra.mxu1 %v3640_v33  ;;  %s4612_s23 = sld [smem:[#allocation9_spill]] }
  0x22   : > { %v601_v6 = vld [vmem:[%s600_s24] sm:$0xff]  ;;  %v602_v19 = vld [vmem:[%s600_s24 + $0x8] sm:$0xff]  ;;  %3642 = vmatprep.subr.bf16.mxu1 %v3867_v32  ;;  %s4592_s28 = smov 88   ;;  %s4585_s24 = smov 80  }
  0x23   : > { %v621_v7 = vrot.slane %v601_v6, %v4033_v2  ;;  %v607_v8 = vrot.slane %v601_v6, %v606_v3  ;;  %v635_v9 = vrot.slane %v601_v6, %v634_v4  ;;  %v614_v10 = vrot.slane %v601_v6, %v613_v5 }
  0x24   : > { %v649_v13 = vrot.slane %v601_v6, %v648_v11  ;;  %v642_v14 = vrot.slane %v601_v6, %v641_v12  ;;  %v656_v17 = vrot.slane %v601_v6, %v655_v15  ;;  %v628_v18 = vrot.slane %v601_v6, %v627_v16 }
  0x25   : > { %623 = vbcast.lane.b32.xlu1 %v621_v7, 256  ;;  %609 = vbcast.lane.b32.xlu0 %v607_v8, 256  ;;  %v670_v20 = vrot.slane %v602_v19, %v613_v5  ;;  %v663_v21 = vrot.slane %v602_v19, %v606_v3  ;;  %v684_v22 = vrot.slane %v602_v19, %v627_v16 }
  0x26   : > { %v677_v23 = vrot.slane %v602_v19, %v4033_v2  ;;  %v698_v24 = vrot.slane %v602_v19, %v641_v12  ;;  %v691_v25 = vrot.slane %v602_v19, %v634_v4  ;;  %v737_v26 = vrot.slane %v602_v19, %v648_v11 }
  0x27   : > { %v776_v27 = vrot.slane %v602_v19, %v655_v15 }
  0x29   : > { %637 = vbcast.lane.b32.xlu1 %v635_v9, 256  ;;  %616 = vbcast.lane.b32.xlu0 %v614_v10, 256 }
  0x2d   : > { %651 = vbcast.lane.b32.xlu1 %v649_v13, 256  ;;  %644 = vbcast.lane.b32.xlu0 %v642_v14, 256 }
  0x31   : > { %658 = vbcast.lane.b32.xlu1 %v656_v17, 256  ;;  %630 = vbcast.lane.b32.xlu0 %v628_v18, 256 }
  0x35   : > { %672 = vbcast.lane.b32.xlu1 %v670_v20, 256  ;;  %665 = vbcast.lane.b32.xlu0 %v663_v21, 256 }
  0x39   : > { %686 = vbcast.lane.b32.xlu1 %v684_v22, 256  ;;  %679 = vbcast.lane.b32.xlu0 %v677_v23, 256 }
  0x3d   : > { %700 = vbcast.lane.b32.xlu1 %v698_v24, 256  ;;  %693 = vbcast.lane.b32.xlu0 %v691_v25, 256 }
  0x41   : > { %739 = vbcast.lane.b32.xlu0 %v737_v26, 256  ;;  %778 = vbcast.lane.b32.xlu1 %v776_v27, 256 }
  0x97   : > { %v624_v35 = vpop.permute.xlu1 %623  ;;  %v610_v36 = vpop.permute.xlu0 %609 }
  0x98   : > { %v746_v42 = vmul.f32 %v4060_v37, %v624_v35  ;;  %v706_v44 = vmul.f32 %v4062_v38, %v610_v36  ;;  %v784_v47 = vmul.f32 %v4065_v39, %v624_v35  ;;  %v708_v2 = vmul.f32 %v4062_v38, %v624_v35 }
  0x9b   : > { %v638_v40 = vpop.permute.xlu1 %637  ;;  %v617_v41 = vpop.permute.xlu0 %616 }
  0x9c   : > { %v707_v43 = vmul.f32 %v4062_v38, %v617_v41  ;;  %v745_v45 = vmul.f32 %v4060_v37, %v617_v41  ;;  %v710_v53 = vmul.f32 %v4062_v38, %v638_v40  ;;  %v748_v58 = vmul.f32 %v4060_v37, %v638_v40 }
  0x9d   : > { %v786_v10 = vmul.f32 %v4065_v39, %v638_v40 }
  0x9e   : > { %v760_v46 = vadd.f32 %v746_v42, %v707_v43  ;;  %v759_v48 = vadd.f32 %v745_v45, %v706_v44 }
  0x9f   : > { %v652_v49 = vpop.permute.xlu1 %651  ;;  %v645_v50 = vpop.permute.xlu0 %644 }
  0xa0   : > { %v750_v51 = vmul.f32 %v4060_v37, %v652_v49  ;;  %v711_v52 = vmul.f32 %v4062_v38, %v645_v50  ;;  %v798_v54 = vadd.f32 %v784_v47, %v759_v48  ;;  %v788_v55 = vmul.f32 %v4065_v39, %v652_v49 }
  0xa1   : > { %v749_v56 = vmul.f32 %v4060_v37, %v645_v50  ;;  %v712_v62 = vmul.f32 %v4062_v38, %v652_v49  ;;  %v787_v6 = vmul.f32 %v4065_v39, %v645_v50 }
  0xa2   : > { %v764_v57 = vadd.f32 %v750_v51, %v711_v52  ;;  %v813_v11 = vsel %vm812_vm1, %v798_v54, -inf }
  0xa3   : > { %v763_v59 = vadd.f32 %v749_v56, %v710_v53  ;;  %v659_v60 = vpop.permute.xlu1 %658  ;;  %v631_v61 = vpop.permute.xlu0 %630 }
  0xa4   : > { %v751_v63 = vmul.f32 %v4060_v37, %v659_v60  ;;  %v789_v0 = vmul.f32 %v4065_v39, %v659_v60  ;;  %v709_v1 = vmul.f32 %v4062_v38, %v631_v61  ;;  %v747_v4 = vmul.f32 %v4060_v37, %v631_v61 }
  0xa5   : > { %v802_v3 = vadd.f32 %v788_v55, %v763_v59  ;;  %v785_v5 = vmul.f32 %v4065_v39, %v631_v61  ;;  %v713_v20 = vmul.f32 %v4062_v38, %v659_v60 }
  0xa6   : > { %v765_v7 = vadd.f32 %v751_v63, %v712_v62  ;;  %v803_v8 = vadd.f32 %v789_v0, %v764_v57  ;;  %v762_v9 = vadd.f32 %v748_v58, %v709_v1  ;;  %v761_v12 = vadd.f32 %v747_v4, %v708_v2 }
  0xa7   : > { %v799_v13 = vadd.f32 %v785_v5, %v760_v46  ;;  %v673_v14 = vpop.permute.xlu1 %672  ;;  %v666_v15 = vpop.permute.xlu0 %665  ;;  %v817_v16 = vsel %vm812_vm1, %v802_v3, -inf }
  0xa8   : > { %v819_v17 = vsel %vm812_vm1, %v803_v8, -inf  ;;  %v801_v18 = vadd.f32 %v787_v6, %v762_v9  ;;  %v753_v19 = vmul.f32 %v4060_v37, %v673_v14  ;;  %v800_v21 = vadd.f32 %v786_v10, %v761_v12 }
  0xa9   : > { %v814_v22 = vsel %vm812_vm1, %v799_v13, -inf  ;;  %v714_v23 = vmul.f32 %v4062_v38, %v666_v15  ;;  %v791_v25 = vmul.f32 %v4065_v39, %v673_v14  ;;  %v752_v26 = vmul.f32 %v4060_v37, %v666_v15 }
  0xaa   : > { %v820_v24 = vmax.f32 %v814_v22, %v819_v17  ;;  %v790_v27 = vmul.f32 %v4065_v39, %v666_v15  ;;  %v818_v31 = vmax.f32 %v813_v11, %v817_v16  ;;  %v715_v34 = vmul.f32 %v4062_v38, %v673_v14 }
  0xab   : > { %v767_v28 = vadd.f32 %v753_v19, %v714_v23  ;;  %v687_v30 = vpop.permute.xlu1 %686  ;;  %v680_v33 = vpop.permute.xlu0 %679  ;;  %v766_v35 = vadd.f32 %v752_v26, %v713_v20  ;;  %v815_v45 = vsel %vm812_vm1, %v800_v21, -inf  ;;  %v816_v54 = vsel %vm812_vm1, %v801_v18, -inf }
  0xac   : > { %v804_v36 = vadd.f32 %v790_v27, %v765_v7  ;;  %v755_v40 = vmul.f32 %v4060_v37, %v687_v30  ;;  %v793_v41 = vmul.f32 %v4065_v39, %v687_v30  ;;  %v716_v42 = vmul.f32 %v4062_v38, %v680_v33 }
  0xad   : > { %v754_v43 = vmul.f32 %v4060_v37, %v680_v33  ;;  %v792_v44 = vmul.f32 %v4065_v39, %v680_v33  ;;  %v805_v46 = vadd.f32 %v791_v25, %v766_v35  ;;  %v717_v56 = vmul.f32 %v4062_v38, %v687_v30  ;;  %v933_v30 = vld [vmem:[%s4610_s5 + $0x18] sm:$0xff]  ;;  %v3267_v33 = vld [vmem:[%s4613_s4] ss:$0 sm:$0xff]  ;;  %s4617_s4 = smov 112  }
  0xae   : > { %v821_v47 = vsel %vm812_vm1, %v804_v36, -inf  ;;  %v769_v50 = vadd.f32 %v755_v40, %v716_v42  ;;  %v3269_v40 = vld [vmem:[%s4614_s6] ss:$0 sm:$0xff] }
  0xaf   : > { %v822_v48 = vmax.f32 %v815_v45, %v821_v47  ;;  %v768_v49 = vadd.f32 %v754_v43, %v715_v34  ;;  %v806_v51 = vadd.f32 %v792_v44, %v767_v28  ;;  %v701_v52 = vpop.permute.xlu1 %700  ;;  %v694_v53 = vpop.permute.xlu0 %693  ;;  %v823_v55 = vsel %vm812_vm1, %v805_v46, -inf  ;;  %v932_v28 = vld [vmem:[%s4610_s5 + $0x10] sm:$0xff] }
  0xb0   : > { %v757_v57 = vmul.f32 %v4060_v37, %v701_v52  ;;  %v824_v58 = vmax.f32 %v816_v54, %v823_v55  ;;  %v718_v61 = vmul.f32 %v4062_v38, %v694_v53  ;;  %v795_v63 = vmul.f32 %v4065_v39, %v701_v52 }
  0xb1   : > { %v807_v59 = vadd.f32 %v793_v41, %v768_v49  ;;  %v825_v60 = vsel %vm812_vm1, %v806_v51, -inf  ;;  %v756_v0 = vmul.f32 %v4060_v37, %v694_v53  ;;  %v794_v1 = vmul.f32 %v4065_v39, %v694_v53 }
  0xb2   : > { %v826_v62 = vmax.f32 %v818_v31, %v825_v60  ;;  %v719_v2 = vmul.f32 %v4062_v38, %v701_v52  ;;  %v771_v3 = vadd.f32 %v757_v57, %v718_v61  ;;  %v3643_v31 = vpack.c.bf16 %v933_v30, %v932_v28 }
  0xb3   : > { %v740_v4 = vpop.permute.xlu0 %739  ;;  %v779_v5 = vpop.permute.xlu1 %778  ;;  %v827_v6 = vsel %vm812_vm1, %v807_v59, -inf  ;;  %v770_v7 = vadd.f32 %v756_v0, %v717_v56  ;;  %v808_v8 = vadd.f32 %v794_v1, %v769_v50 }
  0xb4   : > { %v758_v9 = vmul.f32 %v4060_v37, %v740_v4  ;;  %v796_v10 = vmul.f32 %v4065_v39, %v740_v4  ;;  %v797_v11 = vmul.f32 %v4065_v39, %v779_v5  ;;  %v828_v12 = vmax.f32 %v820_v24, %v827_v6  ;;  %v3266_v39 = vld [vmem:[%s4612_s23] ss:$0 sm:$0xff]  ;;  %3644 = vmatpush3.bf16.msra.mxu1 %v3643_v31  ;;  %s4583_s23 = smov 64  }
  0xb5   : > { %v809_v13 = vadd.f32 %v795_v63, %v770_v7  ;;  %v829_v14 = vsel %vm812_vm1, %v808_v8, -inf  ;;  %3475 = vmatprep.subr.mxu1 %v3865_v29 }
  0xb6   : > { %v772_v15 = vadd.f32 %v758_v9, %v719_v2  ;;  %v810_v16 = vadd.f32 %v796_v10, %v771_v3  ;;  %v830_v38 = vmax.f32 %v822_v48, %v829_v14 }
  0xb7   : > { %v831_v17 = vsel %vm812_vm1, %v809_v13, -inf }
  0xb8   : > { %v833_v18 = vsel %vm812_vm1, %v810_v16, -inf  ;;  %v811_v19 = vadd.f32 %v797_v11, %v772_v15  ;;  %v832_v20 = vmax.f32 %v824_v58, %v831_v17 }
  0xb9   : > { %v834_v21 = vmax.f32 %v826_v62, %v833_v18 }
  0xba   : > { %v835_v37 = vsel %vm812_vm1, %v811_v19, -inf  ;;  %v838_v22 = vmax.f32 %v830_v38, %v832_v20 }
  0xbb   : > { %v836_v23 = vmax.f32 %v828_v12, %v835_v37 }
  0xbd   : > { %v837_v25 = vmax.f32 %v834_v21, %v836_v23 }
  0xbf   : > { %v839_v24 = vmax.f32 %v837_v25, %v838_v22 }
  0xc1   : > { %v847_v26 = vadd.f32 %v3266_v39, %v839_v24 }
  0xc3   : > { %v848_v27 = vmax.f32 %v847_v26, 0.0 }
  0xc5   : > { %3442 = vmatmul.mubr.msk.f32.vlgmr.msra.gmra.mrb[0].mxu0 %vm812_vm1, %v848_v27 }
  0xc6   : > { %3457 = vmatprep.mubr.msk.f32.mxu0 %vm3866_vm0, %v3865_v29 }
 0x198   : > { %v926_v34 = vpop.f32.mrb[0].mxu0 }
 0x199   : > { %v4139_v35 = vadd.f32 %v3267_v33, %v926_v34  ;;  %v3443_v36 = vpop.f32.mrb[1].mxu0 }
 0x19b   : > { %3453 = vmatmul.mubr.msk.f32.vlgmr.msra.gmra.mrb[0].mxu1 %vm941_vm2, %v4139_v35 }
 0x19c   : > { %3477 = vmatprep.mubr.msk.f32.mxu1 %vm3866_vm0, %v3865_v29 }
 0x26e   : > { %v1011_v41 = vpop.f32.mrb[0].mxu1 }
 0x26f   : > { %v4148_v42 = vadd.f32 %v3269_v40, %v1011_v41  ;;  %v3454_v43 = vpop.f32.mrb[1].mxu1  ;;  %v1693_v41 = vld [vmem:[%s4569_s7] sm:$0xff] }
 0x271   : > { %1017 = vrot.lane.b32.xlu0 %v4148_v42, %s4591_s27  ;;  %v1015_v45 = vmul.f32 0.35355338, %v4148_v42  ;;  %s4593_s27 = smov 24  }
 0x2e3   : > { %v1018_v44 = vpop.permute.xlu0 %1017 }
 0x2e4   : > { %3456 = vmatpush3.xpose.msk.msra.mxu0 %vm812_vm1, %v1018_v44  ;;  %v1695_v44 = vld [vmem:[%s4569_s7 + $0x10] sm:$0xff] }
 0x2e5   : > { %3460 = vmatprep.subr.mxu0 %v3865_v29 }
 0x2e7   : > { %3458 = vmatmul.mubr.msk.f32.vlgmr.msra.gmra.mrb[2].mxu0 %vm812_vm1, %v1015_v45 }
 0x2e8   : > { %3462 = vmatprep.mubr.msk.f32.mxu0 %vm3866_vm0, %v3865_v29 }
 0x3ba   : > { %v1090_v46 = vpop.f32.mrb[2].mxu0 }
 0x3bb   : > { %v3459_v47 = vpop.f32.mrb[3].mxu0  ;;  %v1094_v48 = vsel %vm812_vm1, %v1090_v46, -inf }
 0x3bc   : > { %1095 = vmax.xlane.f32.xlu1 %v1094_v48 }
 0x3cd   : > { %1183 = vrot.lane.b32.xlu1 %v4148_v42, %s4592_s28  ;;  %s4622_s28 = smov 56  }
 0x3d1   : > { %1181 = vrot.lane.b32.xlu1 %v1015_v45, %s4582_s29  ;;  %s4584_s29 = smov 72  }
 0x3d5   : > { %1346 = vrot.lane.b32.xlu1 %v1015_v45, %s4590_s25  ;;  %s4623_s25 = smov 64  }
 0x3d9   : > { %1511 = vrot.lane.b32.xlu1 %v1015_v45, %s4589_s22  ;;  %v1696_v45 = vld [vmem:[%s4569_s7 + $0x18] sm:$0xff]  ;;  %s4594_s22 = smov 16  }
 0x449   : > { %v1096_v49 = vpop.xlane.xlu1 %1095 }
 0x44a   : > { %v1097_v50 = vsub.f32 %v1090_v46, %v1096_v49  ;;  %v3649_v46 = vpack.c.bf16 %v1696_v45, %v1695_v44 }
 0x44c   : > { %v1098_v51 = vmul.f32 1.442695, %v1097_v50 }
 0x44d   : > { %v1184_v54 = vpop.permute.xlu1 %1183 }
 0x44e   : > { %3761 = vpow2.f32 %v1098_v51 }
 0x451   : > { %v1182_v56 = vpop.permute.xlu1 %1181 }
 0x455   : > { %v1347_v59 = vpop.permute.xlu1 %1346 }
 0x458   : > { %v3762_v52 = vpop.eup %3761 }
 0x459   : > { %v1100_v53 = vsel %vm812_vm1, %v3762_v52, 0.0  ;;  %v1512_v63 = vpop.permute.xlu1 %1511 }
 0x45a   : > { %1101 = vadd.xlane.f32.xlu0 %v1100_v53 }
 0x470   : > { %1105 = vrot.lane.b32.xlu0 %v4148_v42, %s4583_s23  ;;  %s4588_s23 = smov 56  }
 0x474   : > { %1348 = vrot.lane.b32.xlu0 %v4148_v42, %s4585_s24  ;;  %s4587_s24 = smov 48  }
 0x478   : > { %1513 = vrot.lane.b32.xlu0 %v4148_v42, %s4584_s29  ;;  %s4586_s29 = smov 40  }
 0x4e7   : > { %v1102_v55 = vpop.xlane.xlu0 %1101 }
 0x4e8   : > { %3763 = vrcp.f32 %v1102_v55 }
 0x4eb   : > { %v1106_v57 = vpop.permute.xlu0 %1105 }
 0x4ec   : > { %3461 = vmatpush3.msra.mxu0 %v1106_v57 }
 0x4ed   : > { %3465 = vmatprep.subr.mxu0 %v3865_v29 }
 0x4ef   : > { %v1349_v58 = vpop.permute.xlu0 %1348 }
 0x4f0   : > { %3476 = vmatpush3.xpose.msk.msra.mxu1 %vm812_vm1, %v1349_v58 }
 0x4f1   : > { %3485 = vmatprep.subr.mxu1 %v3865_v29 }
 0x4f2   : > { %v3764_v60 = vpop.eup %3763 }
 0x4f3   : > { %v1104_v61 = vmul.f32 %v3764_v60, %v3762_v52  ;;  %v1514_v62 = vpop.permute.xlu0 %1513  ;;  %3478 = vmatmul.mubr.msk.f32.vlgmr.msra.gmra.mrb[2].mxu1 %vm812_vm1, %v1347_v59  ;;  %v3283_v59 = vld [vmem:[%s4570_s8] ss:$0 sm:$0xff] }
 0x4f4   : > { %3486 = vmatpush3.xpose.msk.msra.mxu1 %vm812_vm1, %v1514_v62  ;;  %3487 = vmatprep.mubr.msk.f32.mxu1 %vm3866_vm0, %v3865_v29 }
 0x4f5   : > { %3463 = vmatmul.mubr.msk.f32.vlgmr.msra.gmra.mrb[4].mxu0 %vm812_vm1, %v1104_v61  ;;  %3645 = vmatprep.subr.bf16.mxu1 %v3867_v32 }
 0x4f6   : > { %3466 = vmatpush3.xpose.msk.msra.mxu0 %vm812_vm1, %v1184_v54  ;;  %3467 = vmatprep.mubr.msk.f32.mxu0 %vm3866_vm0, %v3865_v29 }
 0x4f7   : > { %3488 = vmatmul.mubr.msk.f32.vlgmr.msra.gmra.mrb[4].mxu1 %vm812_vm1, %v1512_v63  ;;  %3470 = vmatprep.subr.mxu0 %v3865_v29 }
 0x4f8   : > { %3503 = vmatprep.mubr.msk.f32.mxu1 %vm3866_vm0, %v3865_v29 }
 0x4f9   : > { %3468 = vmatmul.mubr.msk.f32.vlgmr.msra.gmra.mrb[6].mxu0 %vm812_vm1, %v1182_v56 }
 0x4fa   : > { %3472 = vmatprep.mubr.msk.f32.mxu0 %vm3866_vm0, %v3865_v29 }
 0x5c6   : > { %v1420_v0 = vpop.f32.mrb[2].mxu1 }
 0x5c7   : > { %v3479_v1 = vpop.f32.mrb[3].mxu1  ;;  %v1424_v2 = vsel %vm812_vm1, %v1420_v0, -inf }
 0x5c8   : > { %1425 = vmax.xlane.f32.xlu1 %v1424_v2  ;;  %v4191_v3 = vpop.f32.mrb[4].mxu0 }
 0x5c9   : > { %v3464_v4 = vpop.f32.mrb[5].mxu0 }
 0x5ca   : > { %v1585_v5 = vpop.f32.mrb[4].mxu1 }
 0x5cb   : > { %v3489_v6 = vpop.f32.mrb[5].mxu1  ;;  %v1589_v10 = vsel %vm812_vm1, %v1585_v5, -inf }
 0x5cc   : > { %v1255_v7 = vpop.f32.mrb[6].mxu0  ;;  %v1808_v6 = vld [vmem:[%s4573_s11] sm:$0xff] }
 0x5cd   : > { %v3469_v8 = vpop.f32.mrb[7].mxu0  ;;  %v1259_v9 = vsel %vm812_vm1, %v1255_v7, -inf }
 0x5ce   : > { %1260 = vmax.xlane.f32.xlu0 %v1259_v9  ;;  %v1811_v9 = vld [vmem:[%s4573_s11 + $0x18] sm:$0xff] }
 0x5d2   : > { %1590 = vmax.xlane.f32.xlu0 %v1589_v10 }
 0x655   : > { %v1426_v11 = vpop.xlane.xlu1 %1425 }
 0x656   : > { %v1427_v12 = vsub.f32 %v1420_v0, %v1426_v11  ;;  %v1893_v11 = vld [vmem:[%s4575_s13] sm:$0xff] }
 0x658   : > { %v1428_v13 = vmul.f32 1.442695, %v1427_v12  ;;  %v1894_v12 = vld [vmem:[%s4575_s13 + $0x8] sm:$0xff] }
 0x65a   : > { %3765 = vpow2.f32 %v1428_v13  ;;  %v1895_v13 = vld [vmem:[%s4575_s13 + $0x10] sm:$0xff] }
 0x65b   : > { %v1261_v14 = vpop.xlane.xlu0 %1260 }
 0x65c   : > { %v1262_v15 = vsub.f32 %v1255_v7, %v1261_v14  ;;  %v1809_v7 = vld [vmem:[%s4573_s11 + $0x8] sm:$0xff]  ;;  %v3658_v14 = vpack.c.bf16 %v1894_v12, %v1893_v11 }
 0x65d   : > { %v3652_v8 = vpack.c.bf16 %v1809_v7, %v1808_v6 }
 0x65e   : > { %v1263_v17 = vmul.f32 1.442695, %v1262_v15  ;;  %v1896_v15 = vld [vmem:[%s4575_s13 + $0x18] sm:$0xff] }
 0x65f   : > { %v1591_v16 = vpop.xlane.xlu0 %1590 }
 0x660   : > { %v1592_v38 = vsub.f32 %v1585_v5, %v1591_v16  ;;  %v3661_v16 = vpack.c.bf16 %v1896_v15, %v1895_v13 }
 0x662   : > { %v1593_v18 = vmul.f32 1.442695, %v1592_v38  ;;  %v1897_v38 = vld [vmem:[%s4575_s13 + $0x20] sm:$0xff] }
 0x664   : > { %v3766_v19 = vpop.eup %3765  ;;  %3767 = vpow2.f32 %v1593_v18 }
 0x665   : > { %v1430_v20 = vsel %vm812_vm1, %v3766_v19, 0.0  ;;  %3769 = vpow2.f32 %v1263_v17  ;;  %v1898_v17 = vld [vmem:[%s4575_s13 + $0x28] sm:$0xff] }
 0x666   : > { %1431 = vadd.xlane.f32.xlu1 %v1430_v20  ;;  %v3664_v18 = vpack.c.bf16 %v1898_v17, %v1897_v38 }
 0x66e   : > { %v3768_v21 = vpop.eup %3767 }
 0x66f   : > { %v1595_v37 = vsel %vm812_vm1, %v3768_v21, 0.0  ;;  %v3770_v22 = vpop.eup %3769 }
 0x670   : > { %1596 = vadd.xlane.f32.xlu0 %v1595_v37  ;;  %v1265_v23 = vsel %vm812_vm1, %v3770_v22, 0.0 }
 0x674   : > { %1266 = vadd.xlane.f32.xlu0 %v1265_v23 }
 0x677   : > { %1270 = vrot.lane.b32.xlu1 %v4148_v42, %s4588_s23  ;;  %s4615_s23 = smov 88  }
 0x67b   : > { %1600 = vrot.lane.b32.xlu1 %v4148_v42, %s4586_s29  ;;  %s4595_s29 = smov 8  }
 0x68a   : > { %1435 = vrot.lane.b32.xlu0 %v4148_v42, %s4587_s24  ;;  %v1694_v42 = vld [vmem:[%s4569_s7 + $0x8] sm:$0xff]  ;;  %s4616_s24 = smov 96  }
 0x68b   : > { %v3646_v43 = vpack.c.bf16 %v1694_v42, %v1693_v41 }
 0x68d   : > { %3647 = vmatpush3.bf16.msra.mxu1 %v3646_v43 }
 0x68e   : > { %3648 = vmatprep.subr.bf16.mxu1 %v3867_v32 }
 0x691   : > { %3650 = vmatpush3.bf16.msra.mxu1 %v3649_v46 }
 0x692   : > { %3657 = vmatprep.subr.bf16.mxu1 %v3867_v32 }
 0x6f3   : > { %v1432_v25 = vpop.xlane.xlu1 %1431 }
 0x6f7   : > { %v1271_v39 = vpop.permute.xlu1 %1270 }
 0x6f8   : > { %3471 = vmatpush3.msra.mxu0 %v1271_v39 }
 0x6f9   : > { %3480 = vmatprep.subr.mxu0 %v3865_v29 }
 0x6fb   : > { %v1601_v36 = vpop.permute.xlu1 %1600 }
 0x6fd   : > { %v1597_v24 = vpop.xlane.xlu0 %1596 }
 0x701   : > { %v1267_v26 = vpop.xlane.xlu0 %1266 }
 0x702   : > { %3771 = vrcp.f32 %v1267_v26  ;;  %v1899_v26 = vld [vmem:[%s4575_s13 + $0x30] sm:$0xff] }
 0x703   : > { %3773 = vrcp.f32 %v1432_v25  ;;  %v3286_v25 = vld [vmem:[%s4572_s10] ss:$0 sm:$0xff] }
 0x704   : > { %3775 = vrcp.f32 %v1597_v24 }
 0x705   : > { %v1436_v31 = vpop.permute.xlu0 %1435 }
 0x70c   : > { %v3772_v27 = vpop.eup %3771 }
 0x70d   : > { %v1269_v28 = vmul.f32 %v3772_v27, %v3770_v22  ;;  %v3774_v30 = vpop.eup %3773  ;;  %v3285_v22 = vld [vmem:[%s4571_s9] ss:$0 sm:$0xff]  ;;  %v1900_v27 = vld [vmem:[%s4575_s13 + $0x38] sm:$0xff] }
 0x70e   : > { %v1434_v33 = vmul.f32 %v3774_v30, %v3766_v19  ;;  %v3776_v34 = vpop.eup %3775  ;;  %v3287_v30 = vld [vmem:[%s4574_s12] ss:$0 sm:$0xff] }
 0x70f   : > { %3473 = vmatmul.mubr.msk.f32.vlgmr.msra.gmra.mrb[8].mxu0 %vm812_vm1, %v1269_v28  ;;  %v1599_v40 = vmul.f32 %v3776_v34, %v3768_v21  ;;  %v3667_v28 = vpack.c.bf16 %v1900_v27, %v1899_v26 }
 0x710   : > { %3481 = vmatpush3.msra.mxu0 %v1436_v31  ;;  %3482 = vmatprep.mubr.msk.f32.mxu0 %vm3866_vm0, %v3865_v29 }
 0x711   : > { %3490 = vmatprep.subr.mxu0 %v3865_v29 }
 0x713   : > { %3483 = vmatmul.mubr.msk.f32.vlgmr.msra.gmra.mrb[10].mxu0 %vm812_vm1, %v1434_v33 }
 0x714   : > { %3491 = vmatpush3.msra.mxu0 %v1601_v36  ;;  %3492 = vmatprep.mubr.msk.f32.mxu0 %vm3866_vm0, %v3865_v29 }
 0x715   : > { %3651 = vmatprep.subr.bf16.mxu0 %v3867_v32 }
 0x717   : > { %3493 = vmatmul.mubr.msk.f32.vlgmr.msra.gmra.mrb[12].mxu0 %vm812_vm1, %v1599_v40  ;;  %v3289_v40 = vld [vmem:[%s4576_s14] ss:$0 sm:$0xff] }
 0x718   : > { %3514 = vmatprep.mubr.msk.f32.mxu0 %vm3866_vm0, %v3865_v29  ;;  %3653 = vmatpush3.bf16.msra.mxu0 %v3652_v8 }
 0x719   : > { %3654 = vmatprep.subr.bf16.mxu0 %v3867_v32 }
 0x7e2   : > { %v1342_v47 = vpop.f32.mrb[8].mxu0 }
 0x7e3   : > { %1677 = vrot.lane.b32.xlu1 %v1342_v47, %s4595_s29  ;;  %v3474_v48 = vpop.f32.mrb[9].mxu0  ;;  %s4619_s29 = smov 104  }
 0x7e6   : > { %v1507_v49 = vpop.f32.mrb[10].mxu0 }
 0x7e7   : > { %1681 = vrot.lane.b32.xlu0 %v1507_v49, %s4594_s22  ;;  %v3484_v50 = vpop.f32.mrb[11].mxu0  ;;  %s4620_s22 = smov 80  }
 0x7ea   : > { %v1672_v51 = vpop.f32.mrb[12].mxu0 }
 0x7eb   : > { %1685 = vrot.lane.b32.xlu1 %v1672_v51, %s4593_s27  ;;  %v3494_v52 = vpop.f32.mrb[13].mxu0  ;;  %v3293_v51 = vld [vmem:[%s4610_s5 + $0x20] sm:$0xff]  ;;  %s4618_s27 = smov 120  }
 0x7ec   : > { %v3294_v52 = vld [vmem:[%s4610_s5 + $0x28] sm:$0xff] }
 0x855   : > { %v1678_v53 = vpop.permute.xlu1 %1677 }
 0x856   : > { %v1688_v55 = vsel %vm812_vm1, %v4191_v3, %v1678_v53  ;;  %v3295_v53 = vld [vmem:[%s4610_s5 + $0x30] sm:$0xff] }
 0x859   : > { %v1682_v54 = vpop.permute.xlu0 %1681 }
 0x85a   : > { %v1690_v56 = vsel %vm1689_vm3, %v1688_v55, %v1682_v54  ;;  %v3670_v54 = vpack.c.bf16 %v3294_v52, %v3293_v51  ;;  %v3296_v55 = vld [vmem:[%s4610_s5 + $0x38] sm:$0xff] }
 0x85d   : > { %v1686_v57 = vpop.permute.xlu1 %1685 }
 0x85e   : > { %v1692_v58 = vsel %vm1691_vm4, %v1690_v56, %v1686_v57  ;;  %v3673_v56 = vpack.c.bf16 %v3296_v55, %v3295_v53 }
 0x85f   : > { %3504 = vmatmul.mubr.msk.f32.vlgmr.msra.gmra.mrb[6].mxu1 %vm941_vm2, %v1692_v58 }
 0x860   : > { %3533 = vmatprep.mubr.msk.f32.mxu1 %vm3866_vm0, %v3865_v29  ;;  %3659 = vmatpush3.bf16.msra.mxu1 %v3658_v14 }
 0x861   : > { %3660 = vmatprep.subr.bf16.mxu1 %v3867_v32 }
 0x864   : > { %3662 = vmatpush3.bf16.msra.mxu1 %v3661_v16 }
 0x865   : > { %3663 = vmatprep.subr.bf16.mxu1 %v3867_v32 }
 0x868   : > { %3665 = vmatpush3.bf16.msra.mxu1 %v3664_v18 }
 0x869   : > { %3666 = vmatprep.subr.bf16.mxu1 %v3867_v32 }
 0x86c   : > { %3668 = vmatpush3.bf16.msra.mxu1 %v3667_v28 }
 0x86d   : > { %3557 = vmatprep.subr.mxu1 %v3865_v29 }
 0x932   : > { %v1773_v60 = vpop.f32.mrb[6].mxu1 }
 0x933   : > { %v1774_v61 = vadd.f32 %v3283_v59, %v1773_v60  ;;  %v3505_v62 = vpop.f32.mrb[7].mxu1 }
 0x935   : > { %v1777_v63 = vadd.f32 %v1774_v61, %v4139_v35  ;;  %v1810_v35 = vld [vmem:[%s4573_s11 + $0x10] sm:$0xff]  ;;  %v3291_v61 = vld [vmem:[%s4577_s15] ss:$0 sm:$0xff] }
 0x936   : > { %v3655_v10 = vpack.c.bf16 %v1811_v9, %v1810_v35 }
 0x937   : > { %v1780_v0 = vsel %vm941_vm2, %v1777_v63, 0.0 }
 0x938   : > { %1781 = vadd.xlane.f32.xlu0 %v1780_v0  ;;  %3656 = vmatpush3.bf16.msra.mxu0 %v3655_v10 }
 0x939   : > { %3669 = vmatprep.subr.bf16.mxu0 %v3867_v32 }
 0x9c5   : > { %v1782_v1 = vpop.xlane.xlu0 %1781 }
 0x9c6   : > { %v1784_v2 = vmul.f32 0.03125, %v1782_v1 }
 0x9c8   : > { %v1785_v3 = vsub.f32 %v1777_v63, %v1784_v2  ;;  %v3292_v63 = vld [vmem:[%s4578_s16] ss:$0 sm:$0xff]  ;;  %v3298_v2 = vld [vmem:[%s4614_s6 + $0x1] ss:$0 sm:$0xff] }
 0x9ca   : > { %v1786_v4 = vmul.f32 %v1785_v3, %v1785_v3 }
 0x9cc   : > { %v1787_v5 = vsel %vm941_vm2, %v1786_v4, 0.0 }
 0x9cd   : > { %1788 = vadd.xlane.f32.xlu1 %v1787_v5 }
 0xa5a   : > { %v1789_v19 = vpop.xlane.xlu1 %1788 }
 0xa5b   : > { %v1790_v20 = vmul.f32 0.03125, %v1789_v19 }
 0xa5d   : > { %v1791_v21 = vadd.f32 1e-05, %v1790_v20 }
 0xa5f   : > { %3777 = vrsqrt.f32 %v1791_v21 }
 0xa69   : > { %v3778_v37 = vpop.eup %3777 }
 0xa6a   : > { %v1793_v23 = vmul.f32 %v3778_v37, %v1785_v3 }
 0xa6c   : > { %v1800_v39 = vmul.f32 %v3285_v22, %v1793_v23 }
 0xa6e   : > { %v1807_v24 = vadd.f32 %v3286_v25, %v1800_v39 }
 0xa70   : > { %3515 = vmatmul.mubr.msk.f32.vlgmr.msra.gmra.mrb[14].mxu0 %vm941_vm2, %v1807_v24 }
 0xa71   : > { %3544 = vmatprep.mubr.msk.f32.mxu0 %vm3866_vm0, %v3865_v29  ;;  %3671 = vmatpush3.bf16.msra.mxu0 %v3670_v54 }
 0xa72   : > { %3672 = vmatprep.subr.bf16.mxu0 %v3867_v32 }
 0xa75   : > { %3674 = vmatpush3.bf16.msra.mxu0 %v3673_v56 }
 0xa76   : > { %3547 = vmatprep.subr.mxu0 %v3865_v29 }
 0xb43   : > { %v1888_v31 = vpop.f32.mrb[14].mxu0 }
 0xb44   : > { %v1889_v33 = vadd.f32 %v3287_v30, %v1888_v31  ;;  %v3516_v34 = vpop.f32.mrb[15].mxu0 }
 0xb46   : > { %v1892_v36 = vmax.f32 %v1889_v33, 0.0 }
 0xb48   : > { %3534 = vmatmul.mubr.msk.f32.vlgmr.msra.gmra.mrb[8].mxu1 %vm1908_vm5, %v1892_v36 }
 0xb49   : > { %3559 = vmatprep.mubr.msk.f32.mxu1 %vm3866_vm0, %v3865_v29 }
 0xc1b   : > { %v1978_v41 = vpop.f32.mrb[8].mxu1 }
 0xc1c   : > { %v1979_v42 = vadd.f32 %v3289_v40, %v1978_v41  ;;  %v3535_v43 = vpop.f32.mrb[9].mxu1 }
 0xc1e   : > { %v1982_v44 = vadd.f32 %v1979_v42, %v1807_v24 }
 0xc20   : > { %v1985_v45 = vsel %vm941_vm2, %v1982_v44, 0.0 }
 0xc21   : > { %1986 = vadd.xlane.f32.xlu0 %v1985_v45 }
 0xcae   : > { %v1987_v46 = vpop.xlane.xlu0 %1986 }
 0xcaf   : > { %v1988_v47 = vmul.f32 0.03125, %v1987_v46 }
 0xcb1   : > { %v1989_v48 = vsub.f32 %v1982_v44, %v1988_v47 }
 0xcb3   : > { %v1990_v49 = vmul.f32 %v1989_v48, %v1989_v48 }
 0xcb5   : > { %v1991_v50 = vsel %vm941_vm2, %v1990_v49, 0.0 }
 0xcb6   : > { %1992 = vadd.xlane.f32.xlu0 %v1991_v50 }
 0xd43   : > { %v1993_v57 = vpop.xlane.xlu0 %1992 }
 0xd44   : > { %v1994_v58 = vmul.f32 0.03125, %v1993_v57 }
 0xd46   : > { %v1995_v59 = vadd.f32 1e-05, %v1994_v58 }
 0xd48   : > { %3779 = vrsqrt.f32 %v1995_v59 }
 0xd52   : > { %v3780_v60 = vpop.eup %3779 }
 0xd53   : > { %v1997_v62 = vmul.f32 %v3780_v60, %v1989_v48 }
 0xd55   : > { %v2004_v0 = vmul.f32 %v3291_v61, %v1997_v62 }
 0xd57   : > { %v4328_v1 = vadd.f32 %v3292_v63, %v2004_v0  ;;  %v3312_v0 = vld [vmem:[%s4569_s7 + $0x20] sm:$0xff] }
 0xd59   : > { %3545 = vmatmul.mubr.msk.f32.vlgmr.msra.gmra.mrb[16].mxu0 %vm941_vm2, %v4328_v1 }
 0xd5a   : > { %3549 = vmatprep.mubr.msk.f32.mxu0 %vm3866_vm0, %v3865_v29 }
 0xe2c   : > { %v2094_v3 = vpop.f32.mrb[16].mxu0 }
 0xe2d   : > { %v4337_v4 = vadd.f32 %v3298_v2, %v2094_v3  ;;  %v3546_v5 = vpop.f32.mrb[17].mxu0  ;;  %v3313_v2 = vld [vmem:[%s4569_s7 + $0x28] sm:$0xff] }
 0xe2e   : > { %v3676_v3 = vpack.c.bf16 %v3313_v2, %v3312_v0 }
 0xe2f   : > { %2266 = vrot.lane.b32.xlu0 %v4337_v4, %s4615_s23  ;;  %2100 = vrot.lane.b32.xlu1 %v4337_v4, %s4616_s24  ;;  %v2098_v6 = vmul.f32 0.35355338, %v4337_v4  ;;  %s4624_s23 = smov 48   ;;  %s4625_s24 = smov 40  }
 0xe33   : > { %2429 = vrot.lane.b32.xlu0 %v2098_v6, %s4617_s4  ;;  %2264 = vrot.lane.b32.xlu1 %v2098_v6, %s4618_s27  ;;  %s4627_s4 = smov 16   ;;  %s4628_s27 = smov 24  }
 0xe37   : > { %2594 = vrot.lane.b32.xlu0 %v2098_v6, %s4619_s29  ;;  %2431 = vrot.lane.b32.xlu1 %v4337_v4, %s4620_s22  ;;  %s3348_s22 = sshll.u32 %s4004_s1, 7  ;;  %s3882_s1 = smov [#allocation2]  }
 0xe3b   : > { %2596 = vrot.lane.b32.xlu1 %v4337_v4, %s4621_s20  ;;  %s4626_s20 = smov 8  }
 0xea1   : > { %v2267_v7 = vpop.permute.xlu0 %2266  ;;  %v2101_v35 = vpop.permute.xlu1 %2100 }
 0xea2   : > { %3548 = vmatpush3.xpose.msk.msra.mxu0 %vm812_vm1, %v2101_v35  ;;  %3558 = vmatpush3.xpose.msk.msra.mxu1 %vm812_vm1, %v2267_v7  ;;  %v3314_v35 = vld [vmem:[%s4569_s7 + $0x30] sm:$0xff] }
 0xea3   : > { %3567 = vmatprep.subr.mxu1 %v3865_v29  ;;  %3552 = vmatprep.subr.mxu0 %v3865_v29 }
 0xea5   : > { %v2265_v8 = vpop.permute.xlu1 %2264  ;;  %3550 = vmatmul.mubr.msk.f32.vlgmr.msra.gmra.mrb[18].mxu0 %vm812_vm1, %v2098_v6  ;;  %v2430_v10 = vpop.permute.xlu0 %2429 }
 0xea6   : > { %3560 = vmatmul.mubr.msk.f32.vlgmr.msra.gmra.mrb[10].mxu1 %vm812_vm1, %v2265_v8  ;;  %3554 = vmatprep.mubr.msk.f32.mxu0 %vm3866_vm0, %v3865_v29  ;;  %v3315_v8 = vld [vmem:[%s4569_s7 + $0x38] sm:$0xff] }
 0xea7   : > { %3569 = vmatprep.mubr.msk.f32.mxu1 %vm3866_vm0, %v3865_v29 }
 0xea9   : > { %v2432_v9 = vpop.permute.xlu1 %2431  ;;  %v2595_v12 = vpop.permute.xlu0 %2594 }
 0xeaa   : > { %3568 = vmatpush3.xpose.msk.msra.mxu1 %vm812_vm1, %v2432_v9  ;;  %v3679_v9 = vpack.c.bf16 %v3315_v8, %v3314_v35 }
 0xeab   : > { %3577 = vmatprep.subr.mxu1 %v3865_v29 }
 0xead   : > { %3570 = vmatmul.mubr.msk.f32.vlgmr.msra.gmra.mrb[12].mxu1 %vm812_vm1, %v2430_v10  ;;  %v2597_v11 = vpop.permute.xlu1 %2596 }
 0xeae   : > { %3578 = vmatpush3.xpose.msk.msra.mxu1 %vm812_vm1, %v2597_v11  ;;  %3579 = vmatprep.mubr.msk.f32.mxu1 %vm3866_vm0, %v3865_v29 }
 0xeaf   : > { %3675 = vmatprep.subr.bf16.mxu1 %v3867_v32 }
 0xeb1   : > { %3580 = vmatmul.mubr.msk.f32.vlgmr.msra.gmra.mrb[14].mxu1 %vm812_vm1, %v2595_v12 }
 0xeb2   : > { %3595 = vmatprep.mubr.msk.f32.mxu1 %vm3866_vm0, %v3865_v29  ;;  %3677 = vmatpush3.bf16.msra.mxu1 %v3676_v3 }
 0xeb3   : > { %3678 = vmatprep.subr.bf16.mxu1 %v3867_v32 }
 0xeb6   : > { %3680 = vmatpush3.bf16.msra.mxu1 %v3679_v9 }
 0xeb7   : > { %3687 = vmatprep.subr.bf16.mxu1 %v3867_v32 }
 0xf78   : > { %v2173_v13 = vpop.f32.mrb[18].mxu0 }
 0xf79   : > { %v3551_v14 = vpop.f32.mrb[19].mxu0  ;;  %v2338_v15 = vpop.f32.mrb[10].mxu1  ;;  %v2177_v16 = vsel %vm812_vm1, %v2173_v13, -inf }
 0xf7a   : > { %v3561_v38 = vpop.f32.mrb[11].mxu1  ;;  %2178 = vmax.xlane.f32.xlu1 %v2177_v16  ;;  %v2342_v17 = vsel %vm812_vm1, %v2338_v15, -inf }
 0xf7b   : > { %2343 = vmax.xlane.f32.xlu0 %v2342_v17 }
 0xf80   : > { %v2503_v18 = vpop.f32.mrb[12].mxu1 }
 0xf81   : > { %v3571_v19 = vpop.f32.mrb[13].mxu1  ;;  %v2507_v20 = vsel %vm812_vm1, %v2503_v18, -inf }
 0xf82   : > { %2508 = vmax.xlane.f32.xlu0 %v2507_v20  ;;  %v3317_v19 = vld [vmem:[%s4570_s8 + $0x1] ss:$0 sm:$0xff] }
 0xf84   : > { %v2668_v21 = vpop.f32.mrb[14].mxu1 }
 0xf85   : > { %v3581_v37 = vpop.f32.mrb[15].mxu1  ;;  %v2672_v22 = vsel %vm812_vm1, %v2668_v21, -inf }
 0xf86   : > { %2673 = vmax.xlane.f32.xlu1 %v2672_v22 }
 0xf97   : > { %2353 = vrot.lane.b32.xlu1 %v4337_v4, %s4622_s28 }
0x1007   : > { %v2179_v23 = vpop.xlane.xlu1 %2178 }
0x1008   : > { %v2180_v25 = vsub.f32 %v2173_v13, %v2179_v23  ;;  %v2344_v39 = vpop.xlane.xlu0 %2343 }
0x1009   : > { %v2345_v24 = vsub.f32 %v2338_v15, %v2344_v39 }
0x100a   : > { %v2181_v26 = vmul.f32 1.442695, %v2180_v25 }
0x100b   : > { %v2346_v27 = vmul.f32 1.442695, %v2345_v24 }
0x100c   : > { %3781 = vpow2.f32 %v2181_v26 }
0x100d   : > { %3783 = vpow2.f32 %v2346_v27 }
0x100f   : > { %v2509_v43 = vpop.xlane.xlu0 %2508 }
0x1010   : > { %v2510_v44 = vsub.f32 %v2503_v18, %v2509_v43  ;;  %v3333_v43 = vld [vmem:[%s4575_s13 + $0x58] sm:$0xff] }
0x1012   : > { %v2511_v45 = vmul.f32 1.442695, %v2510_v44 }
0x1013   : > { %v2674_v28 = vpop.xlane.xlu1 %2673 }
0x1014   : > { %v2675_v30 = vsub.f32 %v2668_v21, %v2674_v28  ;;  %v3323_v28 = vld [vmem:[%s4573_s11 + $0x20] sm:$0xff] }
0x1016   : > { %v3782_v31 = vpop.eup %3781  ;;  %v2676_v33 = vmul.f32 1.442695, %v2675_v30  ;;  %v3324_v30 = vld [vmem:[%s4573_s11 + $0x28] sm:$0xff] }
0x1017   : > { %v3784_v34 = vpop.eup %3783  ;;  %v2183_v36 = vsel %vm812_vm1, %v3782_v31, 0.0  ;;  %v2354_v48 = vpop.permute.xlu1 %2353 }
0x1018   : > { %3785 = vpow2.f32 %v2676_v33  ;;  %2184 = vadd.xlane.f32.xlu0 %v2183_v36  ;;  %v2348_v40 = vsel %vm812_vm1, %v3784_v34, 0.0  ;;  %v3326_v33 = vld [vmem:[%s4573_s11 + $0x38] sm:$0xff]  ;;  %v3330_v36 = vld [vmem:[%s4575_s13 + $0x40] sm:$0xff] }
0x1019   : > { %2349 = vadd.xlane.f32.xlu1 %v2348_v40  ;;  %3787 = vpow2.f32 %v2511_v45  ;;  %v3331_v40 = vld [vmem:[%s4575_s13 + $0x48] sm:$0xff]  ;;  %v3334_v45 = vld [vmem:[%s4575_s13 + $0x60] sm:$0xff] }
0x1022   : > { %v3786_v41 = vpop.eup %3785 }
0x1023   : > { %v2678_v42 = vsel %vm812_vm1, %v3786_v41, 0.0  ;;  %v3788_v46 = vpop.eup %3787 }
0x1024   : > { %2679 = vadd.xlane.f32.xlu1 %v2678_v42  ;;  %v2513_v47 = vsel %vm812_vm1, %v3788_v46, 0.0  ;;  %v3688_v42 = vpack.c.bf16 %v3331_v40, %v3330_v36 }
0x102e   : > { %2188 = vrot.lane.b32.xlu0 %v4337_v4, %s4623_s25 }
0x1035   : > { %2518 = vrot.lane.b32.xlu1 %v4337_v4, %s4624_s23  ;;  %s4519_s23 = scalar_lea.hbm %s4581_s19, %s3348_s22 }
0x104d   : > { %2514 = vadd.xlane.f32.xlu0 %v2513_v47 }
0x1063   : > { %2683 = vrot.lane.b32.xlu0 %v4337_v4, %s4625_s24  ;;  %s593_s24 = sand.u32 1, %s3855_s30  }
0x10a5   : > { %v2185_v49 = vpop.xlane.xlu0 %2184 }
0x10a6   : > { %3789 = vrcp.f32 %v2185_v49  ;;  %v2350_v50 = vpop.xlane.xlu1 %2349 }
0x10a7   : > { %3791 = vrcp.f32 %v2350_v50 }
0x10a9   : > { %v2189_v51 = vpop.permute.xlu0 %2188 }
0x10aa   : > { %3553 = vmatpush3.msra.mxu0 %v2189_v51 }
0x10ab   : > { %3562 = vmatprep.subr.mxu0 %v3865_v29 }
0x10b0   : > { %v3790_v52 = vpop.eup %3789 }
0x10b1   : > { %v2187_v53 = vmul.f32 %v3790_v52, %v3782_v31  ;;  %v2680_v54 = vpop.xlane.xlu1 %2679  ;;  %v3792_v55 = vpop.eup %3791  ;;  %v3682_v31 = vpack.c.bf16 %v3324_v30, %v3323_v28  ;;  %v3321_v52 = vld [vmem:[%s4571_s9 + $0x1] ss:$0 sm:$0xff] }
0x10b2   : > { %v2352_v56 = vmul.f32 %v3792_v55, %v3784_v34 }
0x10b3   : > { %3555 = vmatmul.mubr.msk.f32.vlgmr.msra.gmra.mrb[20].mxu0 %vm812_vm1, %v2187_v53 }
0x10b4   : > { %3563 = vmatpush3.msra.mxu0 %v2354_v48  ;;  %3564 = vmatprep.mubr.msk.f32.mxu0 %vm3866_vm0, %v3865_v29 }
0x10b5   : > { %v2519_v57 = vpop.permute.xlu1 %2518  ;;  %3572 = vmatprep.subr.mxu0 %v3865_v29 }
0x10b7   : > { %3565 = vmatmul.mubr.msk.f32.vlgmr.msra.gmra.mrb[22].mxu0 %vm812_vm1, %v2352_v56 }
0x10b8   : > { %3573 = vmatpush3.msra.mxu0 %v2519_v57  ;;  %3574 = vmatprep.mubr.msk.f32.mxu0 %vm3866_vm0, %v3865_v29  ;;  %v3336_v57 = vld [vmem:[%s4575_s13 + $0x70] sm:$0xff] }
0x10b9   : > { %3582 = vmatprep.subr.mxu0 %v3865_v29 }
0x10da   : > { %v2515_v58 = vpop.xlane.xlu0 %2514 }
0x10db   : > { %3793 = vrcp.f32 %v2515_v58  ;;  %v3337_v58 = vld [vmem:[%s4575_s13 + $0x78] sm:$0xff] }
0x10dc   : > { %3795 = vrcp.f32 %v2680_v54  ;;  %v3322_v54 = vld [vmem:[%s4572_s10 + $0x1] ss:$0 sm:$0xff] }
0x10de   : > { %v2684_v62 = vpop.permute.xlu0 %2683 }
0x10e5   : > { %v3794_v59 = vpop.eup %3793 }
0x10e6   : > { %v2517_v60 = vmul.f32 %v3794_v59, %v3788_v46  ;;  %v3796_v61 = vpop.eup %3795  ;;  %v3335_v46 = vld [vmem:[%s4575_s13 + $0x68] sm:$0xff]  ;;  %v3697_v59 = vpack.c.bf16 %v3337_v58, %v3336_v57 }
0x10e7   : > { %v2682_v63 = vmul.f32 %v3796_v61, %v3786_v41  ;;  %v3332_v41 = vld [vmem:[%s4575_s13 + $0x50] sm:$0xff]  ;;  %v3694_v47 = vpack.c.bf16 %v3335_v46, %v3334_v45 }
0x10e8   : > { %3575 = vmatmul.mubr.msk.f32.vlgmr.msra.gmra.mrb[24].mxu0 %vm812_vm1, %v2517_v60  ;;  %v3691_v44 = vpack.c.bf16 %v3333_v43, %v3332_v41  ;;  %v3328_v60 = vld [vmem:[%s4574_s12 + $0x1] ss:$0 sm:$0xff] }
0x10e9   : > { %3583 = vmatpush3.msra.mxu0 %v2684_v62  ;;  %3584 = vmatprep.mubr.msk.f32.mxu0 %vm3866_vm0, %v3865_v29 }
0x10ea   : > { %3681 = vmatprep.subr.bf16.mxu0 %v3867_v32 }
0x10ec   : > { %3585 = vmatmul.mubr.msk.f32.vlgmr.msra.gmra.mrb[26].mxu0 %vm812_vm1, %v2682_v63 }
0x10ed   : > { %3606 = vmatprep.mubr.msk.f32.mxu0 %vm3866_vm0, %v3865_v29  ;;  %3683 = vmatpush3.bf16.msra.mxu0 %v3682_v31 }
0x10ee   : > { %3684 = vmatprep.subr.bf16.mxu0 %v3867_v32 }
0x1186   : > { %v2260_v4 = vpop.f32.mrb[20].mxu0 }
0x1187   : > { %v3556_v5 = vpop.f32.mrb[21].mxu0 }
0x118a   : > { %v2425_v6 = vpop.f32.mrb[22].mxu0 }
0x118b   : > { %2760 = vrot.lane.b32.xlu1 %v2425_v6, %s4626_s20  ;;  %v3566_v7 = vpop.f32.mrb[23].mxu0 }
0x11bb   : > { %v2590_v10 = vpop.f32.mrb[24].mxu0 }
0x11bc   : > { %2764 = vrot.lane.b32.xlu0 %v2590_v10, %s4627_s4  ;;  %v3576_v11 = vpop.f32.mrb[25].mxu0  ;;  %s3263_s4 = sshll.u32 %s593_s24, 3 }
0x11bd   : > { %v3101_v11 = vld [vmem:[%s4579_s17] sm:$0xff]  ;;  %s595_s20 = scalar_lea.vmem [#allocation2], %s3263_s4  ;;  %s3805_s4 = sshll.u32 %s3882_s1, 4  ;;  %s3806_s4 = int_to_ptr.vmem [resolvable:$false] %s3805_s4 }
0x11be   : > { %s3200_s5 = sshll.u32 %s595_s20, 4  ;;  %s3807_s6 = scalar_lea.vmem %s3806_s4, 256  ;;  %s4521_s5 = int_to_ptr.vmem [resolvable:$true] %s3200_s5 }
0x11bf   : > { %v2755_v12 = vpop.f32.mrb[26].mxu0  ;;  %s3801_s29 = scalar_lea.vmem %s4521_s5, 128  ;;  %p3808_p0 = scmp.lt.s32.totalorder %s4521_s5, %s3806_s4 }
0x11c0   : > { %2768 = vrot.lane.b32.xlu1 %v2755_v12, %s4628_s27  ;;  %v3586_v13 = vpop.f32.mrb[27].mxu0  ;;  %v3102_v12 = vld [vmem:[%s4579_s17 + $0x8] sm:$0xff]  ;;  %s3187_s27 = scalar_lea.sflag [#allocation3], %s593_s24  ;;  %p3802_p11 = scmp.ne.s32.totalorder %s4521_s5, %s3801_s29 }
0x11c1   : > { %v3700_v13 = vpack.c.bf16 %v3102_v12, %v3101_v11  ;;  %p3809_p1 = scmp.lt.s32.totalorder %s3807_s6, %s3801_s29 }
0x11c2   : > { %p3803_p12 = pnand %p3802_p11, %p4021_p5 }
0x11c3   : > { %p3810_p2 = por %p3809_p1, %p3808_p0 }
0x11c4   : > { %p3804_p13 = pneg %p3803_p12 }
0x11c6   : > { %p3811_p3 = pnand %p3810_p2, %p3804_p13 }
0x11fd   : > { %v2761_v14 = vpop.permute.xlu1 %2760 }
0x11fe   : > { %v2771_v16 = vsel %vm812_vm1, %v2260_v4, %v2761_v14  ;;  %v3103_v14 = vld [vmem:[%s4579_s17 + $0x10] sm:$0xff] }
0x122e   : > { %v2765_v15 = vpop.permute.xlu0 %2764 }
0x122f   : > { %v2772_v38 = vsel %vm1689_vm3, %v2771_v16, %v2765_v15  ;;  %v3104_v15 = vld [vmem:[%s4579_s17 + $0x18] sm:$0xff] }
0x1230   : > { %v3703_v16 = vpack.c.bf16 %v3104_v15, %v3103_v14 }
0x1232   : > { %v2769_v17 = vpop.permute.xlu1 %2768 }
0x1233   : > { %v2773_v18 = vsel %vm1691_vm4, %v2772_v38, %v2769_v17 }
0x1234   : > { %3596 = vmatmul.mubr.msk.f32.vlgmr.msra.gmra.mrb[16].mxu1 %vm941_vm2, %v2773_v18 }
0x1235   : > { %3625 = vmatprep.mubr.msk.f32.mxu1 %vm3866_vm0, %v3865_v29  ;;  %3689 = vmatpush3.bf16.msra.mxu1 %v3688_v42 }
0x1236   : > { %3690 = vmatprep.subr.bf16.mxu1 %v3867_v32 }
0x1239   : > { %3692 = vmatpush3.bf16.msra.mxu1 %v3691_v44 }
0x123a   : > { %3693 = vmatprep.subr.bf16.mxu1 %v3867_v32 }
0x123d   : > { %3695 = vmatpush3.bf16.msra.mxu1 %v3694_v47 }
0x123e   : > { %3696 = vmatprep.subr.bf16.mxu1 %v3867_v32 }
0x1241   : > { %3698 = vmatpush3.bf16.msra.mxu1 %v3697_v59 }
0x1307   : > { %v2856_v20 = vpop.f32.mrb[16].mxu1 }
0x1308   : > { %v2857_v21 = vadd.f32 %v3317_v19, %v2856_v20  ;;  %v3597_v37 = vpop.f32.mrb[17].mxu1  ;;  %v3343_v20 = vld [vmem:[%s4577_s15 + $0x1] ss:$0 sm:$0xff] }
0x1309   : > { %v3344_v37 = vld [vmem:[%s4578_s16 + $0x1] ss:$0 sm:$0xff] }
0x130a   : > { %v2860_v22 = vadd.f32 %v2857_v21, %v4328_v1  ;;  %v3325_v1 = vld [vmem:[%s4573_s11 + $0x30] sm:$0xff] }
0x130b   : > { %v3685_v34 = vpack.c.bf16 %v3326_v33, %v3325_v1 }
0x130c   : > { %v2865_v23 = vsel %vm941_vm2, %v2860_v22, 0.0 }
0x130d   : > { %2866 = vadd.xlane.f32.xlu0 %v2865_v23  ;;  %3686 = vmatpush3.bf16.msra.mxu0 %v3685_v34 }
0x130e   : > { %3699 = vmatprep.subr.bf16.mxu0 %v3867_v32 }
0x139a   : > { %v2867_v25 = vpop.xlane.xlu0 %2866 }
0x139b   : > { %v2868_v39 = vmul.f32 0.03125, %v2867_v25 }
0x139d   : > { %v2869_v24 = vsub.f32 %v2860_v22, %v2868_v39 }
0x139f   : > { %v2870_v26 = vmul.f32 %v2869_v24, %v2869_v24 }
0x13a1   : > { %v2871_v27 = vsel %vm941_vm2, %v2870_v26, 0.0 }
0x13a2   : > { %2872 = vadd.xlane.f32.xlu1 %v2871_v27 }
0x142f   : > { %v2873_v48 = vpop.xlane.xlu1 %2872 }
0x1430   : > { %v2874_v49 = vmul.f32 0.03125, %v2873_v48 }
0x1432   : > { %v2875_v50 = vadd.f32 1e-05, %v2874_v49 }
0x1434   : > { %3797 = vrsqrt.f32 %v2875_v50 }
0x143e   : > { %v3798_v51 = vpop.eup %3797 }
0x143f   : > { %v2877_v53 = vmul.f32 %v3798_v51, %v2869_v24 }
0x1441   : > { %v2884_v55 = vmul.f32 %v3321_v52, %v2877_v53 }
0x1443   : > { %v2891_v56 = vadd.f32 %v3322_v54, %v2884_v55 }
0x1445   : > { %3607 = vmatmul.mubr.msk.f32.vlgmr.msra.gmra.mrb[28].mxu0 %vm941_vm2, %v2891_v56 }
0x1446   : > { %3636 = vmatprep.mubr.msk.f32.mxu0 %vm3866_vm0, %v3865_v29  ;;  %v3339_v29 = vld [vmem:[%s4576_s14 + $0x1] ss:$0 sm:$0xff]  ;;  %3701 = vmatpush3.bf16.msra.mxu0 %v3700_v13 }
0x1447   : > { %3702 = vmatprep.subr.bf16.mxu0 %v3867_v32  ;;  %v3345_v32 = vld [vmem:[%s4580_s18] ss:$0 sm:$0xff] }
0x144a   : > { %3704 = vmatpush3.bf16.msra.mxu0 %v3703_v16 }
0x1518   : > { %v2974_v61 = vpop.f32.mrb[28].mxu0 }
0x1519   : > { %v2975_v62 = vadd.f32 %v3328_v60, %v2974_v61  ;;  %v3608_v63 = vpop.f32.mrb[29].mxu0 }
0x151b   : > { %v2978_v0 = vmax.f32 %v2975_v62, 0.0 }
0x151d   : > { %3626 = vmatmul.mubr.msk.f32.vlgmr.msra.gmra.mrb[18].mxu1 %vm1908_vm5, %v2978_v0 }
0x15f0   : > { %v3065_v2 = vpop.f32.mrb[18].mxu1 }
0x15f1   : > { %v3066_v3 = vadd.f32 %v3339_v29, %v3065_v2  ;;  %v3627_v4 = vpop.f32.mrb[19].mxu1 }
0x15f3   : > { %v3069_v5 = vadd.f32 %v3066_v3, %v2891_v56 }
0x15f5   : > { %v3074_v6 = vsel %vm941_vm2, %v3069_v5, 0.0 }
0x15f6   : > { %3075 = vadd.xlane.f32.xlu0 %v3074_v6 }
0x1683   : > { %v3076_v7 = vpop.xlane.xlu0 %3075 }
0x1684   : > { %v3077_v35 = vmul.f32 0.03125, %v3076_v7 }
0x1686   : > { %v3078_v8 = vsub.f32 %v3069_v5, %v3077_v35 }
0x1688   : > { %v3079_v9 = vmul.f32 %v3078_v8, %v3078_v8 }
0x168a   : > { %v3080_v10 = vsel %vm941_vm2, %v3079_v9, 0.0 }
0x168b   : > { %3081 = vadd.xlane.f32.xlu0 %v3080_v10 }
0x1718   : > { %v3082_v38 = vpop.xlane.xlu0 %3081 }
0x1719   : > { %v3083_v17 = vmul.f32 0.03125, %v3082_v38 }
0x171b   : > { %v3084_v18 = vadd.f32 1e-05, %v3083_v17 }
0x171d   : > { %3799 = vrsqrt.f32 %v3084_v18 }
0x1727   : > { %v3800_v19 = vpop.eup %3799 }
0x1728   : > { %v3086_v21 = vmul.f32 %v3800_v19, %v3078_v8 }
0x172a   : > { %v3093_v22 = vmul.f32 %v3343_v20, %v3086_v21 }
0x172c   : > { %v3100_v23 = vadd.f32 %v3344_v37, %v3093_v22 }
0x172e   : > { %3637 = vmatmul.mubr.msk.f32.vlgmr.msra.gmra.mrb[30].mxu0 %vm941_vm2, %v3100_v23 }
0x1801   : > { %v3181_v25 = vpop.f32.mrb[30].mxu0 }
0x1802   : > { %v3182_v39 = vadd.f32 %v3345_v32, %v3181_v25  ;;  %v3638_v24 = vpop.f32.mrb[31].mxu0 }
0x1804   : > { %3185 = vst.msk [vmem:[%s595_s20] sm:$0xff] %vm812_vm1, %v3182_v39 }
0x1805   : > { %3814 = shalt.err (!%p3811_p3)
}
0x1806   : > { %s3815_s24 = scalar_lea.hbm %s4519_s23, 128  ;;  %s3819_s28 = scalar_lea.hbm %s4581_s19, 256 }
0x1807   : > { %p3816_p4 = scmp.ne.s32.totalorder %s4519_s23, %s3815_s24  ;;  %p3820_p9 = scmp.lt.u32.totalorder %s4519_s23, %s4581_s19 }
0x1808   : > { %p3821_p10 = scmp.lt.u32.totalorder %s3819_s28, %s3815_s24  ;;  %p3823_p12 = scmp.lt.u32.totalorder %s3815_s24, %s4519_s23 }
0x1809   : > { %p3817_p7 = pnand %p3816_p4, %p4021_p5 }
0x180a   : > { %p3822_p11 = por %p3821_p10, %p3820_p9 }
0x180b   : > { %p3818_p8 = pneg %p3817_p7 }
0x180c   : > { %p3824_p13 = por %p3823_p12, %p3822_p11 }
0x180e   : > { %p3825_p0 = pnand %p3824_p13, %p3818_p8 }
0x1810   : > { %3828 = shalt.err (!%p3825_p0)
}
0x1811   : > { %3705 = dma.vmem_to_hbm [thread:$0]  (%p4021_p5), %s4521_s5, 128, %s4519_s23, %s3187_s27  }
0x1812 PF: > { %p3711_p1 = scmp.ge.s32.totalorder %s3863_s21, 2  ;;  %s3212_s6 = sand.u32 1, %s3851_s0  }
0x1813   : > { %s3213_s29 = scalar_lea.sflag [#allocation3], %s3212_s6 }
0x1814   : > { %p3708_p2 = pnand %p3711_p1, %p4025_p6 }
0x1816   : > { %3846 = dma.done.wait (!%p3708_p2), %s3213_s29, 128  }
0x1817   : > { %3848 = vsyncadd (!%p3708_p2), %s3213_s29, 4294967168  ;;  %s4629_s4 = sld [smem:[#allocation5_spill]]  ;;  %s4630_s20 = sld [smem:[#allocation6_spill]] }
0x1818   : > { %p29_p3 = scmp.ge.s32.totalorder %s4008_s2, 4   ;;  %s4631_s0 = smov %s3855_s30 }
0x1819   : > { %s4633_s21 = smov %s4008_s2 }
0x181a   :  { %31 = sbr.rel (!%p29_p3) target bundleno = 11 (0xb), region = 143 }
0x181d   : > { %s4632_s30 = smov %s4629_s4 }
0x1821   :  { %3218 = vsyncpa [#allocation3], 1 }
0x1822   :  { %3220 = vsyncpa [#allocation3 + $0x1], 1 }

</bundles_post_ra>
